<compile_context>
chip_gen: v5e
topology: v5e:2x2
jax: 0.10.0
libtpu: 0.0.40
codegen_flags: <defaults>
</compile_context>

<pallas_src>
import functools

import jax
import jax.numpy as jnp
from jax.experimental import pallas as pl
from jax.experimental.pallas import tpu as pltpu

EPS = 1e-5  # nn.GroupNorm default


# ----------------------- in-kernel helpers -----------------------
def _silu(y):
    # y * sigmoid(y); sigmoid via tanh (EUP, overflow-safe)
    return y * (0.5 * (jnp.tanh(0.5 * y) + 1.0))


def _gn_silu(x, gamma, beta, pmat):
    """GroupNorm + SiLU on a (C, HW) tile, all statistics in f32.

    Lane-reduce first (XLU) -> (C, 1), then mix with the tiny (C, C) group
    matrix (pmat[i, j] = 1/(Cg*HW) iff channels i, j share a group), so the
    per-group mean/variance broadcast back to every channel without running
    the MXU over the (C, HW) activations.
    """
    s = jnp.sum(x, axis=1, keepdims=True)                            # (C, 1)
    mean = jnp.dot(pmat, s, preferred_element_type=jnp.float32)      # (C, 1)
    d = x - mean
    ss = jnp.sum(d * d, axis=1, keepdims=True)                       # (C, 1)
    var = jnp.dot(pmat, ss, preferred_element_type=jnp.float32)      # biased
    y = d * jax.lax.rsqrt(var + EPS) * gamma + beta
    return _silu(y)


def _stacked_taps_bf16(h, mask_ref, H, W):
    """(C, HW) f32 -> (9*C, HW) bf16 stacked 3x3 taps.

    Tap k = kh*3+kw is h shifted by (kh-1)*W + (kw-1) along the flattened
    spatial axis (static pltpu.roll, XLU); out-of-image positions are zeroed
    by the precomputed border mask (== the conv's zero padding).  The taps
    are stacked along the contraction axis so the conv is ONE K=9*C MXU dot.
    """
    HW = H * W
    taps = []
    for kh in range(3):
        for kw in range(3):
            off = (kh - 1) * W + (kw - 1)
            if off == 0:
                taps.append(h)                       # center tap: mask is all-ones
            else:
                k = kh * 3 + kw
                taps.append(pltpu.roll(h, shift=(-off) % HW, axis=1)
                            * mask_ref[k])
    return jnp.concatenate(taps, axis=0).astype(jnp.bfloat16)


# ----------------------- fused block kernel -----------------------
def _make_block_kernel(H, W, conv_shortcut):
    if conv_shortcut:
        # out = conv2(SiLU(GN2(conv1(SiLU(GN1(x))) + b1 + temb)))
        #       + (b2 + bs) + conv_s(x)
        def kernel(x_ref, g1_ref, bt1_ref, p1_ref, w1_ref, add1_ref,
                   g2_ref, bt2_ref, p2_ref, w2_ref, bias2_ref, ws_ref,
                   mask_ref, o_ref):
            x = x_ref[...]
            h1 = _gn_silu(x, g1_ref[...], bt1_ref[...], p1_ref[...])
            t1 = _stacked_taps_bf16(h1, mask_ref, H, W)
            h = jnp.dot(w1_ref[...], t1,
                        preferred_element_type=jnp.float32) + add1_ref[...]
            h2 = _gn_silu(h, g2_ref[...], bt2_ref[...], p2_ref[...])
            t2 = _stacked_taps_bf16(h2, mask_ref, H, W)
            out = jnp.dot(w2_ref[...], t2,
                          preferred_element_type=jnp.float32) + bias2_ref[...]
            tx = _stacked_taps_bf16(x, mask_ref, H, W)
            o_ref[...] = out + jnp.dot(ws_ref[...], tx,
                                       preferred_element_type=jnp.float32)
    else:
        # identity shortcut: out = conv2(...) + b2 + x
        def kernel(x_ref, g1_ref, bt1_ref, p1_ref, w1_ref, add1_ref,
                   g2_ref, bt2_ref, p2_ref, w2_ref, bias2_ref,
                   mask_ref, o_ref):
            x = x_ref[...]
            h1 = _gn_silu(x, g1_ref[...], bt1_ref[...], p1_ref[...])
            t1 = _stacked_taps_bf16(h1, mask_ref, H, W)
            h = jnp.dot(w1_ref[...], t1,
                        preferred_element_type=jnp.float32) + add1_ref[...]
            h2 = _gn_silu(h, g2_ref[...], bt2_ref[...], p2_ref[...])
            t2 = _stacked_taps_bf16(h2, mask_ref, H, W)
            out = jnp.dot(w2_ref[...], t2,
                          preferred_element_type=jnp.float32) + bias2_ref[...]
            o_ref[...] = out + x
    return kernel


# ----------------------- host-side constant builders -----------------------
def _group_avg_matrix(C, n_groups, HW):
    assert C % n_groups == 0
    Cg = C // n_groups
    g = jnp.arange(C) // Cg
    same = (g[:, None] == g[None, :]).astype(jnp.float32)
    return same * (1.0 / float(Cg * HW))                              # (C, C)


def _tap_masks(H, W):
    p = jnp.arange(H * W)
    r, c = p // W, p % W
    masks = []
    for kh in range(3):
        for kw in range(3):
            dr, dc = kh - 1, kw - 1
            ok = ((r + dr >= 0) & (r + dr < H) & (c + dc >= 0) & (c + dc < W))
            masks.append(ok.astype(jnp.float32))
    return jnp.stack(masks).reshape(9, 1, H * W)                      # (9,1,HW)


def _stack_weights_bf16(w):
    # (Cout, Cin, 3, 3) -> (Cout, 9*Cin) bf16; K order (kh, kw, cin) to match
    # the in-kernel tap stacking order (k = kh*3 + kw, then channel).
    Cout, Cin = w.shape[0], w.shape[1]
    return jnp.transpose(w, (0, 2, 3, 1)).reshape(Cout, 9 * Cin).astype(
        jnp.bfloat16)


# ----------------------- ResidualBlock forward -----------------------
@functools.partial(jax.jit, static_argnames=("n_groups",))
def residual_block(x, t, params, n_groups=16):
    B, Cin, H, W = x.shape
    Cout = params["w1"].shape[0]
    HW = H * W
    x_flat = x.reshape(B, Cin, HW)
    conv_shortcut = (Cin != Cout)

    # Time-embedding Linear on SiLU(t) is a sub-vreg matmul -> plain JAX;
    # it is pre-summed with conv1's bias into one per-(batch,channel) add.
    ts = t * jax.nn.sigmoid(t)
    temb = ts @ params["wt"].T + params["bt"]                         # (B, Cout)
    add1 = (temb + params["b1"]).reshape(B, Cout, 1)
    bias2 = params["b2"] + (params["bs"] if conv_shortcut else 0.0)

    masks = _tap_masks(H, W)
    p1 = _group_avg_matrix(Cin, n_groups, HW)
    p2 = _group_avg_matrix(Cout, n_groups, HW)
    w1s = _stack_weights_bf16(params["w1"])
    w2s = _stack_weights_bf16(params["w2"])

    const2 = lambda i: (0, 0)
    const3 = lambda i: (0, 0, 0)
    per_b = lambda i: (i, 0, 0)

    in_specs = [
        pl.BlockSpec((None, Cin, HW), per_b),        # x
        pl.BlockSpec((Cin, 1), const2),              # gamma1
        pl.BlockSpec((Cin, 1), const2),              # beta1
        pl.BlockSpec((Cin, Cin), const2),            # group-avg matrix 1
        pl.BlockSpec((Cout, 9 * Cin), const2),       # w1 stacked (bf16)
        pl.BlockSpec((None, Cout, 1), per_b),        # b1 + temb[b]
        pl.BlockSpec((Cout, 1), const2),             # gamma2
        pl.BlockSpec((Cout, 1), const2),             # beta2
        pl.BlockSpec((Cout, Cout), const2),          # group-avg matrix 2
        pl.BlockSpec((Cout, 9 * Cout), const2),      # w2 stacked (bf16)
        pl.BlockSpec((Cout, 1), const2),             # b2 (+ bs)
    ]
    args = [
        x_flat,
        params["gamma1"].reshape(Cin, 1), params["beta1"].reshape(Cin, 1),
        p1, w1s, add1,
        params["gamma2"].reshape(Cout, 1), params["beta2"].reshape(Cout, 1),
        p2, w2s, bias2.reshape(Cout, 1),
    ]
    if conv_shortcut:
        in_specs.append(pl.BlockSpec((Cout, 9 * Cin), const2))   # ws stacked
        args.append(_stack_weights_bf16(params["ws"]))
    in_specs.append(pl.BlockSpec((9, 1, HW), const3))            # border masks
    args.append(masks)

    out = pl.pallas_call(
        _make_block_kernel(H, W, conv_shortcut),
        out_shape=jax.ShapeDtypeStruct((B, Cout, HW), jnp.float32),
        grid=(B,),
        in_specs=in_specs,
        out_specs=pl.BlockSpec((None, Cout, HW), per_b),
        compiler_params=pltpu.CompilerParams(
            dimension_semantics=("parallel",)),
    )(*args)
    return out.reshape(B, Cout, H, W)


# ----------------------- pure-JAX f32 reference -----------------------
def _ref_forward(x, t, params, n_groups):
    def gn(z, gamma, beta):
        B, C, H, W = z.shape
        zr = z.reshape(B, n_groups, C // n_groups, H * W)
        mean = zr.mean(axis=(2, 3), keepdims=True)
        var = ((zr - mean) ** 2).mean(axis=(2, 3), keepdims=True)
        zn = ((zr - mean) / jnp.sqrt(var + EPS)).reshape(B, C, H, W)
        return zn * gamma[None, :, None, None] + beta[None, :, None, None]

    def conv(z, w, b):
        y = jax.lax.conv_general_dilated(
            z, w, (1, 1), [(1, 1), (1, 1)],
            dimension_numbers=("NCHW", "OIHW", "NCHW"))
        return y + b[None, :, None, None]

    silu = lambda z: z * jax.nn.sigmoid(z)
    h = conv(silu(gn(x, params["gamma1"], params["beta1"])),
             params["w1"], params["b1"])
    temb = silu(t) @ params["wt"].T + params["bt"]
    h = h + temb[:, :, None, None]
    h = conv(silu(gn(h, params["gamma2"], params["beta2"])),
             params["w2"], params["b2"])
    if x.shape[1] == params["w1"].shape[0]:
        h = h + x
    else:
        h = h + conv(x, params["ws"], params["bs"])
    return h


def init_params(key, in_ch, out_ch, time_ch):
    ks = jax.random.split(key, 8)

    def u(k, shape, fan_in):
        bound = 1.0 / float(fan_in) ** 0.5
        return jax.random.uniform(k, shape, jnp.float32, -bound, bound)

    return dict(
        w1=u(ks[0], (out_ch, in_ch, 3, 3), in_ch * 9),
        b1=u(ks[1], (out_ch,), in_ch * 9),
        w2=u(ks[2], (out_ch, out_ch, 3, 3), out_ch * 9),
        b2=u(ks[3], (out_ch,), out_ch * 9),
        wt=u(ks[4], (out_ch, time_ch), time_ch),
        bt=u(ks[5], (out_ch,), time_ch),
        ws=u(ks[6], (out_ch, in_ch, 3, 3), in_ch * 9),
        bs=u(ks[7], (out_ch,), in_ch * 9),
        gamma1=jnp.ones((in_ch,), jnp.float32),
        beta1=jnp.zeros((in_ch,), jnp.float32),
        gamma2=jnp.ones((out_ch,), jnp.float32),
        beta2=jnp.zeros((out_ch,), jnp.float32),
    )


if __name__ == "__main__":
    n_groups = 16
    configs = [
        (2, 16, 32, 8, 16, 16),   # in_ch != out_ch: fused 3x3 shortcut conv
        (2, 32, 32, 8, 16, 16),   # in_ch == out_ch: identity shortcut
    ]
    key = jax.random.PRNGKey(0)
    for (B, in_ch, out_ch, time_ch, H, W) in configs:
        key, kx, kt, kp = jax.random.split(key, 4)
        x = jax.random.normal(kx, (B, in_ch, H, W), jnp.float32)
        t = jax.random.normal(kt, (B, time_ch), jnp.float32)
        params = init_params(kp, in_ch, out_ch, time_ch)

        out = jax.block_until_ready(
            residual_block(x, t, params, n_groups=n_groups))
        ref = _ref_forward(x, t, params, n_groups)

        assert out.shape == (B, out_ch, H, W)
        # bf16 MXU operands (f32 accumulation / statistics) vs f32 reference
        # -> tolerance loosened per review rather than hiding the cast.
        assert jnp.allclose(out, ref, atol=5e-2, rtol=5e-2), \
            "mismatch vs reference"
    print("KERNEL_OK")
</pallas_src>

<mosaic_0001>
module attributes {stable_mosaic.version = 11 : i64} {
  func.func @kernel(%arg0: i32, %arg1: memref<1x16x256xf32, #tpu.memory_space<vmem>>, %arg2: memref<16x1xf32, #tpu.memory_space<vmem>>, %arg3: memref<16x1xf32, #tpu.memory_space<vmem>>, %arg4: memref<16x16xf32, #tpu.memory_space<vmem>>, %arg5: memref<32x144xbf16, #tpu.memory_space<vmem>>, %arg6: memref<1x32x1xf32, #tpu.memory_space<vmem>>, %arg7: memref<32x1xf32, #tpu.memory_space<vmem>>, %arg8: memref<32x1xf32, #tpu.memory_space<vmem>>, %arg9: memref<32x32xf32, #tpu.memory_space<vmem>>, %arg10: memref<32x288xbf16, #tpu.memory_space<vmem>>, %arg11: memref<32x1xf32, #tpu.memory_space<vmem>>, %arg12: memref<32x144xbf16, #tpu.memory_space<vmem>>, %arg13: memref<9x1x256xf32, #tpu.memory_space<vmem>>, %arg14: memref<1x32x256xf32, #tpu.memory_space<vmem>>) attributes {dimension_semantics = [#tpu.dimension_semantics<parallel>], iteration_bounds = array<i64: 2>, scalar_prefetch = 0 : i64, scratch_operands = 0 : i64, tpu.core_type = #tpu.core_type<tc>, window_params = [{transform_indices = @transform_0, window_bounds = array<i64: 1, 16, 256>}, {pipeline_mode = #tpu.pipeline_mode<synchronous>, transform_indices = @transform_1, window_bounds = array<i64: 16, 1>}, {pipeline_mode = #tpu.pipeline_mode<synchronous>, transform_indices = @transform_2, window_bounds = array<i64: 16, 1>}, {pipeline_mode = #tpu.pipeline_mode<synchronous>, transform_indices = @transform_3, window_bounds = array<i64: 16, 16>}, {pipeline_mode = #tpu.pipeline_mode<synchronous>, transform_indices = @transform_4, window_bounds = array<i64: 32, 144>}, {transform_indices = @transform_5, window_bounds = array<i64: 1, 32, 1>}, {pipeline_mode = #tpu.pipeline_mode<synchronous>, transform_indices = @transform_6, window_bounds = array<i64: 32, 1>}, {pipeline_mode = #tpu.pipeline_mode<synchronous>, transform_indices = @transform_7, window_bounds = array<i64: 32, 1>}, {pipeline_mode = #tpu.pipeline_mode<synchronous>, transform_indices = @transform_8, window_bounds = array<i64: 32, 32>}, {pipeline_mode = #tpu.pipeline_mode<synchronous>, transform_indices = @transform_9, window_bounds = array<i64: 32, 288>}, {pipeline_mode = #tpu.pipeline_mode<synchronous>, transform_indices = @transform_10, window_bounds = array<i64: 32, 1>}, {pipeline_mode = #tpu.pipeline_mode<synchronous>, transform_indices = @transform_11, window_bounds = array<i64: 32, 144>}, {pipeline_mode = #tpu.pipeline_mode<synchronous>, transform_indices = @transform_12, window_bounds = array<i64: 9, 1, 256>}, {transform_indices = @transform_13, window_bounds = array<i64: 1, 32, 256>}]} {
    %c0 = arith.constant 0 : index
    %c0_0 = arith.constant 0 : index
    %c0_1 = arith.constant 0 : index
    %0 = vector.load %arg1[%c0, %c0_0, %c0_1] : memref<1x16x256xf32, #tpu.memory_space<vmem>>, vector<1x16x256xf32>
    %1 = vector.shape_cast %0 : vector<1x16x256xf32> to vector<16x256xf32>
    %c0_2 = arith.constant 0 : index
    %c0_3 = arith.constant 0 : index
    %2 = vector.load %arg2[%c0_2, %c0_3] : memref<16x1xf32, #tpu.memory_space<vmem>>, vector<16x1xf32>
    %c0_4 = arith.constant 0 : index
    %c0_5 = arith.constant 0 : index
    %3 = vector.load %arg3[%c0_4, %c0_5] : memref<16x1xf32, #tpu.memory_space<vmem>>, vector<16x1xf32>
    %c0_6 = arith.constant 0 : index
    %c0_7 = arith.constant 0 : index
    %4 = vector.load %arg4[%c0_6, %c0_7] : memref<16x16xf32, #tpu.memory_space<vmem>>, vector<16x16xf32>
    %cst = arith.constant dense<0.000000e+00> : vector<16xf32>
    %5 = vector.multi_reduction <add>, %1, %cst [1] : vector<16x256xf32> to vector<16xf32>
    %6 = vector.shape_cast %5 : vector<16xf32> to vector<16x1xf32>
    %cst_8 = arith.constant dense<0.000000e+00> : vector<16x1xf32>
    %7 = tpu.matmul %4, %6, %cst_8 {dimension_numbers = #tpu.dot_dimension_numbers<[1], [0], [0], [1], [0, 0, 1, 1], [], []>} : vector<16x16xf32>, vector<16x1xf32>, vector<16x1xf32> -> vector<16x1xf32>
    %8 = vector.broadcast %7 : vector<16x1xf32> to vector<16x256xf32>
    %9 = arith.subf %1, %8 : vector<16x256xf32>
    %10 = arith.mulf %9, %9 : vector<16x256xf32>
    %cst_9 = arith.constant dense<0.000000e+00> : vector<16xf32>
    %11 = vector.multi_reduction <add>, %10, %cst_9 [1] : vector<16x256xf32> to vector<16xf32>
    %12 = vector.shape_cast %11 : vector<16xf32> to vector<16x1xf32>
    %cst_10 = arith.constant dense<0.000000e+00> : vector<16x1xf32>
    %13 = tpu.matmul %4, %12, %cst_10 {dimension_numbers = #tpu.dot_dimension_numbers<[1], [0], [0], [1], [0, 0, 1, 1], [], []>} : vector<16x16xf32>, vector<16x1xf32>, vector<16x1xf32> -> vector<16x1xf32>
    %cst_11 = arith.constant 9.99999974E-6 : f32
    %14 = vector.broadcast %cst_11 : f32 to vector<16x1xf32>
    %15 = arith.addf %13, %14 : vector<16x1xf32>
    %16 = math.rsqrt %15 : vector<16x1xf32>
    %17 = vector.broadcast %16 : vector<16x1xf32> to vector<16x256xf32>
    %18 = arith.mulf %9, %17 : vector<16x256xf32>
    %19 = vector.broadcast %2 : vector<16x1xf32> to vector<16x256xf32>
    %20 = arith.mulf %18, %19 : vector<16x256xf32>
    %21 = vector.broadcast %3 : vector<16x1xf32> to vector<16x256xf32>
    %22 = arith.addf %20, %21 : vector<16x256xf32>
    %cst_12 = arith.constant 5.000000e-01 : f32
    %23 = vector.broadcast %cst_12 : f32 to vector<16x256xf32>
    %24 = arith.mulf %23, %22 : vector<16x256xf32>
    %25 = math.tanh %24 : vector<16x256xf32>
    %cst_13 = arith.constant 1.000000e+00 : f32
    %26 = vector.broadcast %cst_13 : f32 to vector<16x256xf32>
    %27 = arith.addf %25, %26 : vector<16x256xf32>
    %cst_14 = arith.constant 5.000000e-01 : f32
    %28 = vector.broadcast %cst_14 : f32 to vector<16x256xf32>
    %29 = arith.mulf %28, %27 : vector<16x256xf32>
    %30 = arith.mulf %22, %29 : vector<16x256xf32>
    %c17_i32 = arith.constant 17 : i32
    %31 = tpu.dynamic_rotate %30 by %c17_i32 dim 1 : vector<16x256xf32>, i32 -> vector<16x256xf32>
    %c0_15 = arith.constant 0 : index
    %c0_16 = arith.constant 0 : index
    %c0_17 = arith.constant 0 : index
    %32 = vector.load %arg13[%c0_15, %c0_16, %c0_17] : memref<9x1x256xf32, #tpu.memory_space<vmem>>, vector<1x1x256xf32>
    %33 = vector.shape_cast %32 : vector<1x1x256xf32> to vector<1x256xf32>
    %34 = vector.broadcast %33 : vector<1x256xf32> to vector<16x256xf32>
    %35 = arith.mulf %31, %34 : vector<16x256xf32>
    %c16_i32 = arith.constant 16 : i32
    %36 = tpu.dynamic_rotate %30 by %c16_i32 dim 1 : vector<16x256xf32>, i32 -> vector<16x256xf32>
    %c1 = arith.constant 1 : index
    %c0_18 = arith.constant 0 : index
    %c0_19 = arith.constant 0 : index
    %37 = vector.load %arg13[%c1, %c0_18, %c0_19] : memref<9x1x256xf32, #tpu.memory_space<vmem>>, vector<1x1x256xf32>
    %38 = vector.shape_cast %37 : vector<1x1x256xf32> to vector<1x256xf32>
    %39 = vector.broadcast %38 : vector<1x256xf32> to vector<16x256xf32>
    %40 = arith.mulf %36, %39 : vector<16x256xf32>
    %c15_i32 = arith.constant 15 : i32
    %41 = tpu.dynamic_rotate %30 by %c15_i32 dim 1 : vector<16x256xf32>, i32 -> vector<16x256xf32>
    %c2 = arith.constant 2 : index
    %c0_20 = arith.constant 0 : index
    %c0_21 = arith.constant 0 : index
    %42 = vector.load %arg13[%c2, %c0_20, %c0_21] : memref<9x1x256xf32, #tpu.memory_space<vmem>>, vector<1x1x256xf32>
    %43 = vector.shape_cast %42 : vector<1x1x256xf32> to vector<1x256xf32>
    %44 = vector.broadcast %43 : vector<1x256xf32> to vector<16x256xf32>
    %45 = arith.mulf %41, %44 : vector<16x256xf32>
    %c1_i32 = arith.constant 1 : i32
    %46 = tpu.dynamic_rotate %30 by %c1_i32 dim 1 : vector<16x256xf32>, i32 -> vector<16x256xf32>
    %c3 = arith.constant 3 : index
    %c0_22 = arith.constant 0 : index
    %c0_23 = arith.constant 0 : index
    %47 = vector.load %arg13[%c3, %c0_22, %c0_23] : memref<9x1x256xf32, #tpu.memory_space<vmem>>, vector<1x1x256xf32>
    %48 = vector.shape_cast %47 : vector<1x1x256xf32> to vector<1x256xf32>
    %49 = vector.broadcast %48 : vector<1x256xf32> to vector<16x256xf32>
    %50 = arith.mulf %46, %49 : vector<16x256xf32>
    %c255_i32 = arith.constant 255 : i32
    %51 = tpu.dynamic_rotate %30 by %c255_i32 dim 1 : vector<16x256xf32>, i32 -> vector<16x256xf32>
    %c5 = arith.constant 5 : index
    %c0_24 = arith.constant 0 : index
    %c0_25 = arith.constant 0 : index
    %52 = vector.load %arg13[%c5, %c0_24, %c0_25] : memref<9x1x256xf32, #tpu.memory_space<vmem>>, vector<1x1x256xf32>
    %53 = vector.shape_cast %52 : vector<1x1x256xf32> to vector<1x256xf32>
    %54 = vector.broadcast %53 : vector<1x256xf32> to vector<16x256xf32>
    %55 = arith.mulf %51, %54 : vector<16x256xf32>
    %c241_i32 = arith.constant 241 : i32
    %56 = tpu.dynamic_rotate %30 by %c241_i32 dim 1 : vector<16x256xf32>, i32 -> vector<16x256xf32>
    %c6 = arith.constant 6 : index
    %c0_26 = arith.constant 0 : index
    %c0_27 = arith.constant 0 : index
    %57 = vector.load %arg13[%c6, %c0_26, %c0_27] : memref<9x1x256xf32, #tpu.memory_space<vmem>>, vector<1x1x256xf32>
    %58 = vector.shape_cast %57 : vector<1x1x256xf32> to vector<1x256xf32>
    %59 = vector.broadcast %58 : vector<1x256xf32> to vector<16x256xf32>
    %60 = arith.mulf %56, %59 : vector<16x256xf32>
    %c240_i32 = arith.constant 240 : i32
    %61 = tpu.dynamic_rotate %30 by %c240_i32 dim 1 : vector<16x256xf32>, i32 -> vector<16x256xf32>
    %c7 = arith.constant 7 : index
    %c0_28 = arith.constant 0 : index
    %c0_29 = arith.constant 0 : index
    %62 = vector.load %arg13[%c7, %c0_28, %c0_29] : memref<9x1x256xf32, #tpu.memory_space<vmem>>, vector<1x1x256xf32>
    %63 = vector.shape_cast %62 : vector<1x1x256xf32> to vector<1x256xf32>
    %64 = vector.broadcast %63 : vector<1x256xf32> to vector<16x256xf32>
    %65 = arith.mulf %61, %64 : vector<16x256xf32>
    %c239_i32 = arith.constant 239 : i32
    %66 = tpu.dynamic_rotate %30 by %c239_i32 dim 1 : vector<16x256xf32>, i32 -> vector<16x256xf32>
    %c8 = arith.constant 8 : index
    %c0_30 = arith.constant 0 : index
    %c0_31 = arith.constant 0 : index
    %67 = vector.load %arg13[%c8, %c0_30, %c0_31] : memref<9x1x256xf32, #tpu.memory_space<vmem>>, vector<1x1x256xf32>
    %68 = vector.shape_cast %67 : vector<1x1x256xf32> to vector<1x256xf32>
    %69 = vector.broadcast %68 : vector<1x256xf32> to vector<16x256xf32>
    %70 = arith.mulf %66, %69 : vector<16x256xf32>
    %71 = tpu.concatenate %35, %40, %45, %50, %30, %55, %60, %65, %70 in 0 : vector<16x256xf32>, vector<16x256xf32>, vector<16x256xf32>, vector<16x256xf32>, vector<16x256xf32>, vector<16x256xf32>, vector<16x256xf32>, vector<16x256xf32>, vector<16x256xf32> -> vector<144x256xf32>
    %72 = arith.truncf %71 : vector<144x256xf32> to vector<144x256xbf16>
    %c0_32 = arith.constant 0 : index
    %c0_33 = arith.constant 0 : index
    %73 = vector.load %arg5[%c0_32, %c0_33] : memref<32x144xbf16, #tpu.memory_space<vmem>>, vector<32x144xbf16>
    %cst_34 = arith.constant dense<0.000000e+00> : vector<32x256xf32>
    %74 = tpu.matmul %73, %72, %cst_34 {dimension_numbers = #tpu.dot_dimension_numbers<[1], [0], [0], [1], [0, 0, 1, 1], [], []>} : vector<32x144xbf16>, vector<144x256xbf16>, vector<32x256xf32> -> vector<32x256xf32>
    %c0_35 = arith.constant 0 : index
    %c0_36 = arith.constant 0 : index
    %c0_37 = arith.constant 0 : index
    %75 = vector.load %arg6[%c0_35, %c0_36, %c0_37] : memref<1x32x1xf32, #tpu.memory_space<vmem>>, vector<1x32x1xf32>
    %76 = vector.shape_cast %75 : vector<1x32x1xf32> to vector<32x1xf32>
    %77 = vector.broadcast %76 : vector<32x1xf32> to vector<32x256xf32>
    %78 = arith.addf %74, %77 : vector<32x256xf32>
    %c0_38 = arith.constant 0 : index
    %c0_39 = arith.constant 0 : index
    %79 = vector.load %arg7[%c0_38, %c0_39] : memref<32x1xf32, #tpu.memory_space<vmem>>, vector<32x1xf32>
    %c0_40 = arith.constant 0 : index
    %c0_41 = arith.constant 0 : index
    %80 = vector.load %arg8[%c0_40, %c0_41] : memref<32x1xf32, #tpu.memory_space<vmem>>, vector<32x1xf32>
    %c0_42 = arith.constant 0 : index
    %c0_43 = arith.constant 0 : index
    %81 = vector.load %arg9[%c0_42, %c0_43] : memref<32x32xf32, #tpu.memory_space<vmem>>, vector<32x32xf32>
    %cst_44 = arith.constant dense<0.000000e+00> : vector<32xf32>
    %82 = vector.multi_reduction <add>, %78, %cst_44 [1] : vector<32x256xf32> to vector<32xf32>
    %83 = vector.shape_cast %82 : vector<32xf32> to vector<32x1xf32>
    %cst_45 = arith.constant dense<0.000000e+00> : vector<32x1xf32>
    %84 = tpu.matmul %81, %83, %cst_45 {dimension_numbers = #tpu.dot_dimension_numbers<[1], [0], [0], [1], [0, 0, 1, 1], [], []>} : vector<32x32xf32>, vector<32x1xf32>, vector<32x1xf32> -> vector<32x1xf32>
    %85 = vector.broadcast %84 : vector<32x1xf32> to vector<32x256xf32>
    %86 = arith.subf %78, %85 : vector<32x256xf32>
    %87 = arith.mulf %86, %86 : vector<32x256xf32>
    %cst_46 = arith.constant dense<0.000000e+00> : vector<32xf32>
    %88 = vector.multi_reduction <add>, %87, %cst_46 [1] : vector<32x256xf32> to vector<32xf32>
    %89 = vector.shape_cast %88 : vector<32xf32> to vector<32x1xf32>
    %cst_47 = arith.constant dense<0.000000e+00> : vector<32x1xf32>
    %90 = tpu.matmul %81, %89, %cst_47 {dimension_numbers = #tpu.dot_dimension_numbers<[1], [0], [0], [1], [0, 0, 1, 1], [], []>} : vector<32x32xf32>, vector<32x1xf32>, vector<32x1xf32> -> vector<32x1xf32>
    %cst_48 = arith.constant 9.99999974E-6 : f32
    %91 = vector.broadcast %cst_48 : f32 to vector<32x1xf32>
    %92 = arith.addf %90, %91 : vector<32x1xf32>
    %93 = math.rsqrt %92 : vector<32x1xf32>
    %94 = vector.broadcast %93 : vector<32x1xf32> to vector<32x256xf32>
    %95 = arith.mulf %86, %94 : vector<32x256xf32>
    %96 = vector.broadcast %79 : vector<32x1xf32> to vector<32x256xf32>
    %97 = arith.mulf %95, %96 : vector<32x256xf32>
    %98 = vector.broadcast %80 : vector<32x1xf32> to vector<32x256xf32>
    %99 = arith.addf %97, %98 : vector<32x256xf32>
    %cst_49 = arith.constant 5.000000e-01 : f32
    %100 = vector.broadcast %cst_49 : f32 to vector<32x256xf32>
    %101 = arith.mulf %100, %99 : vector<32x256xf32>
    %102 = math.tanh %101 : vector<32x256xf32>
    %cst_50 = arith.constant 1.000000e+00 : f32
    %103 = vector.broadcast %cst_50 : f32 to vector<32x256xf32>
    %104 = arith.addf %102, %103 : vector<32x256xf32>
    %cst_51 = arith.constant 5.000000e-01 : f32
    %105 = vector.broadcast %cst_51 : f32 to vector<32x256xf32>
    %106 = arith.mulf %105, %104 : vector<32x256xf32>
    %107 = arith.mulf %99, %106 : vector<32x256xf32>
    %c17_i32_52 = arith.constant 17 : i32
    %108 = tpu.dynamic_rotate %107 by %c17_i32_52 dim 1 : vector<32x256xf32>, i32 -> vector<32x256xf32>
    %c0_53 = arith.constant 0 : index
    %c0_54 = arith.constant 0 : index
    %c0_55 = arith.constant 0 : index
    %109 = vector.load %arg13[%c0_53, %c0_54, %c0_55] : memref<9x1x256xf32, #tpu.memory_space<vmem>>, vector<1x1x256xf32>
    %110 = vector.shape_cast %109 : vector<1x1x256xf32> to vector<1x256xf32>
    %111 = vector.broadcast %110 : vector<1x256xf32> to vector<32x256xf32>
    %112 = arith.mulf %108, %111 : vector<32x256xf32>
    %c16_i32_56 = arith.constant 16 : i32
    %113 = tpu.dynamic_rotate %107 by %c16_i32_56 dim 1 : vector<32x256xf32>, i32 -> vector<32x256xf32>
    %c1_57 = arith.constant 1 : index
    %c0_58 = arith.constant 0 : index
    %c0_59 = arith.constant 0 : index
    %114 = vector.load %arg13[%c1_57, %c0_58, %c0_59] : memref<9x1x256xf32, #tpu.memory_space<vmem>>, vector<1x1x256xf32>
    %115 = vector.shape_cast %114 : vector<1x1x256xf32> to vector<1x256xf32>
    %116 = vector.broadcast %115 : vector<1x256xf32> to vector<32x256xf32>
    %117 = arith.mulf %113, %116 : vector<32x256xf32>
    %c15_i32_60 = arith.constant 15 : i32
    %118 = tpu.dynamic_rotate %107 by %c15_i32_60 dim 1 : vector<32x256xf32>, i32 -> vector<32x256xf32>
    %c2_61 = arith.constant 2 : index
    %c0_62 = arith.constant 0 : index
    %c0_63 = arith.constant 0 : index
    %119 = vector.load %arg13[%c2_61, %c0_62, %c0_63] : memref<9x1x256xf32, #tpu.memory_space<vmem>>, vector<1x1x256xf32>
    %120 = vector.shape_cast %119 : vector<1x1x256xf32> to vector<1x256xf32>
    %121 = vector.broadcast %120 : vector<1x256xf32> to vector<32x256xf32>
    %122 = arith.mulf %118, %121 : vector<32x256xf32>
    %c1_i32_64 = arith.constant 1 : i32
    %123 = tpu.dynamic_rotate %107 by %c1_i32_64 dim 1 : vector<32x256xf32>, i32 -> vector<32x256xf32>
    %c3_65 = arith.constant 3 : index
    %c0_66 = arith.constant 0 : index
    %c0_67 = arith.constant 0 : index
    %124 = vector.load %arg13[%c3_65, %c0_66, %c0_67] : memref<9x1x256xf32, #tpu.memory_space<vmem>>, vector<1x1x256xf32>
    %125 = vector.shape_cast %124 : vector<1x1x256xf32> to vector<1x256xf32>
    %126 = vector.broadcast %125 : vector<1x256xf32> to vector<32x256xf32>
    %127 = arith.mulf %123, %126 : vector<32x256xf32>
    %c255_i32_68 = arith.constant 255 : i32
    %128 = tpu.dynamic_rotate %107 by %c255_i32_68 dim 1 : vector<32x256xf32>, i32 -> vector<32x256xf32>
    %c5_69 = arith.constant 5 : index
    %c0_70 = arith.constant 0 : index
    %c0_71 = arith.constant 0 : index
    %129 = vector.load %arg13[%c5_69, %c0_70, %c0_71] : memref<9x1x256xf32, #tpu.memory_space<vmem>>, vector<1x1x256xf32>
    %130 = vector.shape_cast %129 : vector<1x1x256xf32> to vector<1x256xf32>
    %131 = vector.broadcast %130 : vector<1x256xf32> to vector<32x256xf32>
    %132 = arith.mulf %128, %131 : vector<32x256xf32>
    %c241_i32_72 = arith.constant 241 : i32
    %133 = tpu.dynamic_rotate %107 by %c241_i32_72 dim 1 : vector<32x256xf32>, i32 -> vector<32x256xf32>
    %c6_73 = arith.constant 6 : index
    %c0_74 = arith.constant 0 : index
    %c0_75 = arith.constant 0 : index
    %134 = vector.load %arg13[%c6_73, %c0_74, %c0_75] : memref<9x1x256xf32, #tpu.memory_space<vmem>>, vector<1x1x256xf32>
    %135 = vector.shape_cast %134 : vector<1x1x256xf32> to vector<1x256xf32>
    %136 = vector.broadcast %135 : vector<1x256xf32> to vector<32x256xf32>
    %137 = arith.mulf %133, %136 : vector<32x256xf32>
    %c240_i32_76 = arith.constant 240 : i32
    %138 = tpu.dynamic_rotate %107 by %c240_i32_76 dim 1 : vector<32x256xf32>, i32 -> vector<32x256xf32>
    %c7_77 = arith.constant 7 : index
    %c0_78 = arith.constant 0 : index
    %c0_79 = arith.constant 0 : index
    %139 = vector.load %arg13[%c7_77, %c0_78, %c0_79] : memref<9x1x256xf32, #tpu.memory_space<vmem>>, vector<1x1x256xf32>
    %140 = vector.shape_cast %139 : vector<1x1x256xf32> to vector<1x256xf32>
    %141 = vector.broadcast %140 : vector<1x256xf32> to vector<32x256xf32>
    %142 = arith.mulf %138, %141 : vector<32x256xf32>
    %c239_i32_80 = arith.constant 239 : i32
    %143 = tpu.dynamic_rotate %107 by %c239_i32_80 dim 1 : vector<32x256xf32>, i32 -> vector<32x256xf32>
    %c8_81 = arith.constant 8 : index
    %c0_82 = arith.constant 0 : index
    %c0_83 = arith.constant 0 : index
    %144 = vector.load %arg13[%c8_81, %c0_82, %c0_83] : memref<9x1x256xf32, #tpu.memory_space<vmem>>, vector<1x1x256xf32>
    %145 = vector.shape_cast %144 : vector<1x1x256xf32> to vector<1x256xf32>
    %146 = vector.broadcast %145 : vector<1x256xf32> to vector<32x256xf32>
    %147 = arith.mulf %143, %146 : vector<32x256xf32>
    %148 = tpu.concatenate %112, %117, %122, %127, %107, %132, %137, %142, %147 in 0 : vector<32x256xf32>, vector<32x256xf32>, vector<32x256xf32>, vector<32x256xf32>, vector<32x256xf32>, vector<32x256xf32>, vector<32x256xf32>, vector<32x256xf32>, vector<32x256xf32> -> vector<288x256xf32>
    %149 = arith.truncf %148 : vector<288x256xf32> to vector<288x256xbf16>
    %c0_84 = arith.constant 0 : index
    %c0_85 = arith.constant 0 : index
    %150 = vector.load %arg10[%c0_84, %c0_85] : memref<32x288xbf16, #tpu.memory_space<vmem>>, vector<32x288xbf16>
    %cst_86 = arith.constant dense<0.000000e+00> : vector<32x256xf32>
    %151 = tpu.matmul %150, %149, %cst_86 {dimension_numbers = #tpu.dot_dimension_numbers<[1], [0], [0], [1], [0, 0, 1, 1], [], []>} : vector<32x288xbf16>, vector<288x256xbf16>, vector<32x256xf32> -> vector<32x256xf32>
    %c0_87 = arith.constant 0 : index
    %c0_88 = arith.constant 0 : index
    %152 = vector.load %arg11[%c0_87, %c0_88] : memref<32x1xf32, #tpu.memory_space<vmem>>, vector<32x1xf32>
    %153 = vector.broadcast %152 : vector<32x1xf32> to vector<32x256xf32>
    %154 = arith.addf %151, %153 : vector<32x256xf32>
    %c17_i32_89 = arith.constant 17 : i32
    %155 = tpu.dynamic_rotate %1 by %c17_i32_89 dim 1 : vector<16x256xf32>, i32 -> vector<16x256xf32>
    %c0_90 = arith.constant 0 : index
    %c0_91 = arith.constant 0 : index
    %c0_92 = arith.constant 0 : index
    %156 = vector.load %arg13[%c0_90, %c0_91, %c0_92] : memref<9x1x256xf32, #tpu.memory_space<vmem>>, vector<1x1x256xf32>
    %157 = vector.shape_cast %156 : vector<1x1x256xf32> to vector<1x256xf32>
    %158 = vector.broadcast %157 : vector<1x256xf32> to vector<16x256xf32>
    %159 = arith.mulf %155, %158 : vector<16x256xf32>
    %c16_i32_93 = arith.constant 16 : i32
    %160 = tpu.dynamic_rotate %1 by %c16_i32_93 dim 1 : vector<16x256xf32>, i32 -> vector<16x256xf32>
    %c1_94 = arith.constant 1 : index
    %c0_95 = arith.constant 0 : index
    %c0_96 = arith.constant 0 : index
    %161 = vector.load %arg13[%c1_94, %c0_95, %c0_96] : memref<9x1x256xf32, #tpu.memory_space<vmem>>, vector<1x1x256xf32>
    %162 = vector.shape_cast %161 : vector<1x1x256xf32> to vector<1x256xf32>
    %163 = vector.broadcast %162 : vector<1x256xf32> to vector<16x256xf32>
    %164 = arith.mulf %160, %163 : vector<16x256xf32>
    %c15_i32_97 = arith.constant 15 : i32
    %165 = tpu.dynamic_rotate %1 by %c15_i32_97 dim 1 : vector<16x256xf32>, i32 -> vector<16x256xf32>
    %c2_98 = arith.constant 2 : index
    %c0_99 = arith.constant 0 : index
    %c0_100 = arith.constant 0 : index
    %166 = vector.load %arg13[%c2_98, %c0_99, %c0_100] : memref<9x1x256xf32, #tpu.memory_space<vmem>>, vector<1x1x256xf32>
    %167 = vector.shape_cast %166 : vector<1x1x256xf32> to vector<1x256xf32>
    %168 = vector.broadcast %167 : vector<1x256xf32> to vector<16x256xf32>
    %169 = arith.mulf %165, %168 : vector<16x256xf32>
    %c1_i32_101 = arith.constant 1 : i32
    %170 = tpu.dynamic_rotate %1 by %c1_i32_101 dim 1 : vector<16x256xf32>, i32 -> vector<16x256xf32>
    %c3_102 = arith.constant 3 : index
    %c0_103 = arith.constant 0 : index
    %c0_104 = arith.constant 0 : index
    %171 = vector.load %arg13[%c3_102, %c0_103, %c0_104] : memref<9x1x256xf32, #tpu.memory_space<vmem>>, vector<1x1x256xf32>
    %172 = vector.shape_cast %171 : vector<1x1x256xf32> to vector<1x256xf32>
    %173 = vector.broadcast %172 : vector<1x256xf32> to vector<16x256xf32>
    %174 = arith.mulf %170, %173 : vector<16x256xf32>
    %c255_i32_105 = arith.constant 255 : i32
    %175 = tpu.dynamic_rotate %1 by %c255_i32_105 dim 1 : vector<16x256xf32>, i32 -> vector<16x256xf32>
    %c5_106 = arith.constant 5 : index
    %c0_107 = arith.constant 0 : index
    %c0_108 = arith.constant 0 : index
    %176 = vector.load %arg13[%c5_106, %c0_107, %c0_108] : memref<9x1x256xf32, #tpu.memory_space<vmem>>, vector<1x1x256xf32>
    %177 = vector.shape_cast %176 : vector<1x1x256xf32> to vector<1x256xf32>
    %178 = vector.broadcast %177 : vector<1x256xf32> to vector<16x256xf32>
    %179 = arith.mulf %175, %178 : vector<16x256xf32>
    %c241_i32_109 = arith.constant 241 : i32
    %180 = tpu.dynamic_rotate %1 by %c241_i32_109 dim 1 : vector<16x256xf32>, i32 -> vector<16x256xf32>
    %c6_110 = arith.constant 6 : index
    %c0_111 = arith.constant 0 : index
    %c0_112 = arith.constant 0 : index
    %181 = vector.load %arg13[%c6_110, %c0_111, %c0_112] : memref<9x1x256xf32, #tpu.memory_space<vmem>>, vector<1x1x256xf32>
    %182 = vector.shape_cast %181 : vector<1x1x256xf32> to vector<1x256xf32>
    %183 = vector.broadcast %182 : vector<1x256xf32> to vector<16x256xf32>
    %184 = arith.mulf %180, %183 : vector<16x256xf32>
    %c240_i32_113 = arith.constant 240 : i32
    %185 = tpu.dynamic_rotate %1 by %c240_i32_113 dim 1 : vector<16x256xf32>, i32 -> vector<16x256xf32>
    %c7_114 = arith.constant 7 : index
    %c0_115 = arith.constant 0 : index
    %c0_116 = arith.constant 0 : index
    %186 = vector.load %arg13[%c7_114, %c0_115, %c0_116] : memref<9x1x256xf32, #tpu.memory_space<vmem>>, vector<1x1x256xf32>
    %187 = vector.shape_cast %186 : vector<1x1x256xf32> to vector<1x256xf32>
    %188 = vector.broadcast %187 : vector<1x256xf32> to vector<16x256xf32>
    %189 = arith.mulf %185, %188 : vector<16x256xf32>
    %c239_i32_117 = arith.constant 239 : i32
    %190 = tpu.dynamic_rotate %1 by %c239_i32_117 dim 1 : vector<16x256xf32>, i32 -> vector<16x256xf32>
    %c8_118 = arith.constant 8 : index
    %c0_119 = arith.constant 0 : index
    %c0_120 = arith.constant 0 : index
    %191 = vector.load %arg13[%c8_118, %c0_119, %c0_120] : memref<9x1x256xf32, #tpu.memory_space<vmem>>, vector<1x1x256xf32>
    %192 = vector.shape_cast %191 : vector<1x1x256xf32> to vector<1x256xf32>
    %193 = vector.broadcast %192 : vector<1x256xf32> to vector<16x256xf32>
    %194 = arith.mulf %190, %193 : vector<16x256xf32>
    %195 = tpu.concatenate %159, %164, %169, %174, %1, %179, %184, %189, %194 in 0 : vector<16x256xf32>, vector<16x256xf32>, vector<16x256xf32>, vector<16x256xf32>, vector<16x256xf32>, vector<16x256xf32>, vector<16x256xf32>, vector<16x256xf32>, vector<16x256xf32> -> vector<144x256xf32>
    %196 = arith.truncf %195 : vector<144x256xf32> to vector<144x256xbf16>
    %c0_121 = arith.constant 0 : index
    %c0_122 = arith.constant 0 : index
    %197 = vector.load %arg12[%c0_121, %c0_122] : memref<32x144xbf16, #tpu.memory_space<vmem>>, vector<32x144xbf16>
    %cst_123 = arith.constant dense<0.000000e+00> : vector<32x256xf32>
    %198 = tpu.matmul %197, %196, %cst_123 {dimension_numbers = #tpu.dot_dimension_numbers<[1], [0], [0], [1], [0, 0, 1, 1], [], []>} : vector<32x144xbf16>, vector<144x256xbf16>, vector<32x256xf32> -> vector<32x256xf32>
    %199 = arith.addf %154, %198 : vector<32x256xf32>
    %c0_124 = arith.constant 0 : index
    %c0_125 = arith.constant 0 : index
    %c0_126 = arith.constant 0 : index
    %200 = vector.load %arg14[%c0_124, %c0_125, %c0_126] : memref<1x32x256xf32, #tpu.memory_space<vmem>>, vector<1x32x256xf32>
    %201 = vector.shape_cast %200 : vector<1x32x256xf32> to vector<32x256xf32>
    %202 = vector.shape_cast %199 : vector<32x256xf32> to vector<1x32x256xf32>
    tpu.vector_store %arg14[%c0_124, %c0_125, %c0_126], %202 {strides = array<i32>} : memref<1x32x256xf32, #tpu.memory_space<vmem>>, vector<1x32x256xf32>,
    return
  }
  func.func @transform_0(%arg0: i32) -> (i32, i32, i32) {
    %c0_i32 = arith.constant 0 : i32
    %c0_i32_0 = arith.constant 0 : i32
    %c0_i32_1 = arith.constant 0 : i32
    return %arg0, %c0_i32, %c0_i32_0 : i32, i32, i32
  }
  func.func @transform_1(%arg0: i32) -> (i32, i32) {
    %c0_i32 = arith.constant 0 : i32
    %c0_i32_0 = arith.constant 0 : i32
    %c0_i32_1 = arith.constant 0 : i32
    return %c0_i32, %c0_i32_0 : i32, i32
  }
  func.func @transform_2(%arg0: i32) -> (i32, i32) {
    %c0_i32 = arith.constant 0 : i32
    %c0_i32_0 = arith.constant 0 : i32
    %c0_i32_1 = arith.constant 0 : i32
    return %c0_i32, %c0_i32_0 : i32, i32
  }
  func.func @transform_3(%arg0: i32) -> (i32, i32) {
    %c0_i32 = arith.constant 0 : i32
    %c0_i32_0 = arith.constant 0 : i32
    %c0_i32_1 = arith.constant 0 : i32
    return %c0_i32, %c0_i32_0 : i32, i32
  }
  func.func @transform_4(%arg0: i32) -> (i32, i32) {
    %c0_i32 = arith.constant 0 : i32
    %c0_i32_0 = arith.constant 0 : i32
    %c0_i32_1 = arith.constant 0 : i32
    return %c0_i32, %c0_i32_0 : i32, i32
  }
  func.func @transform_5(%arg0: i32) -> (i32, i32, i32) {
    %c0_i32 = arith.constant 0 : i32
    %c0_i32_0 = arith.constant 0 : i32
    %c0_i32_1 = arith.constant 0 : i32
    return %arg0, %c0_i32, %c0_i32_0 : i32, i32, i32
  }
  func.func @transform_6(%arg0: i32) -> (i32, i32) {
    %c0_i32 = arith.constant 0 : i32
    %c0_i32_0 = arith.constant 0 : i32
    %c0_i32_1 = arith.constant 0 : i32
    return %c0_i32, %c0_i32_0 : i32, i32
  }
  func.func @transform_7(%arg0: i32) -> (i32, i32) {
    %c0_i32 = arith.constant 0 : i32
    %c0_i32_0 = arith.constant 0 : i32
    %c0_i32_1 = arith.constant 0 : i32
    return %c0_i32, %c0_i32_0 : i32, i32
  }
  func.func @transform_8(%arg0: i32) -> (i32, i32) {
    %c0_i32 = arith.constant 0 : i32
    %c0_i32_0 = arith.constant 0 : i32
    %c0_i32_1 = arith.constant 0 : i32
    return %c0_i32, %c0_i32_0 : i32, i32
  }
  func.func @transform_9(%arg0: i32) -> (i32, i32) {
    %c0_i32 = arith.constant 0 : i32
    %c0_i32_0 = arith.constant 0 : i32
    %c0_i32_1 = arith.constant 0 : i32
    return %c0_i32, %c0_i32_0 : i32, i32
  }
  func.func @transform_10(%arg0: i32) -> (i32, i32) {
    %c0_i32 = arith.constant 0 : i32
    %c0_i32_0 = arith.constant 0 : i32
    %c0_i32_1 = arith.constant 0 : i32
    return %c0_i32, %c0_i32_0 : i32, i32
  }
  func.func @transform_11(%arg0: i32) -> (i32, i32) {
    %c0_i32 = arith.constant 0 : i32
    %c0_i32_0 = arith.constant 0 : i32
    %c0_i32_1 = arith.constant 0 : i32
    return %c0_i32, %c0_i32_0 : i32, i32
  }
  func.func @transform_12(%arg0: i32) -> (i32, i32, i32) {
    %c0_i32 = arith.constant 0 : i32
    %c0_i32_0 = arith.constant 0 : i32
    %c0_i32_1 = arith.constant 0 : i32
    %c0_i32_2 = arith.constant 0 : i32
    return %c0_i32, %c0_i32_0, %c0_i32_1 : i32, i32, i32
  }
  func.func @transform_13(%arg0: i32) -> (i32, i32, i32) {
    %c0_i32 = arith.constant 0 : i32
    %c0_i32_0 = arith.constant 0 : i32
    %c0_i32_1 = arith.constant 0 : i32
    return %arg0, %c0_i32, %c0_i32_0 : i32, i32, i32
  }
}

</mosaic_0001>

<bundles_post_ra>
// kernel: residual_block.1
= control target key start
LH: loop header
LB: loop body
LE: loop exit
PB: predicated region body
PF: predicated region fallthrough
CT: control target
= control target key end

     0   :  { %s2362_s25 = smov 0   ;;  %s3801_s0 = inlined_call_operand.vmem [shape: f32[2,16,256], index: 0, kind: input, shape index: {}]   ;;  %s3802_s1 = inlined_call_operand.vmem [shape: f32[16,1], index: 1, kind: input, shape index: {}]   ;;  %s3803_s2 = inlined_call_operand.vmem [shape: f32[16,1], index: 2, kind: input, shape index: {}]   ;;  %s3804_s3 = inlined_call_operand.vmem [shape: f32[16,16], index: 3, kind: input, shape index: {}]   ;;  %s3805_s4 = inlined_call_operand.vmem [shape: bf16[32,144], index: 4, kind: input, shape index: {}]   ;;  %s3806_s5 = inlined_call_operand.vmem [shape: f32[2,32,1], index: 5, kind: input, shape index: {}]   ;;  %s3807_s6 = inlined_call_operand.vmem [shape: f32[32,1], index: 6, kind: input, shape index: {}]   ;;  %s3808_s7 = inlined_call_operand.vmem [shape: f32[32,1], index: 7, kind: input, shape index: {}]   ;;  %s3809_s8 = inlined_call_operand.vmem [shape: f32[32,32], index: 8, kind: input, shape index: {}]   ;;  %s3810_s9 = inlined_call_operand.vmem [shape: bf16[32,288], index: 9, kind: input, shape index: {}]   ;;  %s3811_s10 = inlined_call_operand.vmem [shape: f32[32,1], index: 10, kind: input, shape index: {}]   ;;  %s3812_s11 = inlined_call_operand.vmem [shape: bf16[32,144], index: 11, kind: input, shape index: {}]   ;;  %s3813_s12 = inlined_call_operand.vmem [shape: f32[9,1,256], index: 12, kind: input, shape index: {}]   ;;  %s3814_s13 = inlined_call_operand.vmem [shape: f32[2,32,256], index: 13, kind: output, shape index: {}]  }
   0x1 LB: > { %s2090_s26 = sadd.s32 4294967295, %s2281_s25   ;;  %p2094_p0 = scmp.ge.s32.totalorder %s2281_s25, 1  ;;  %s2281_s25 = sphi %s2362_s25, %s23_s25  }
   0x2   : > { %p397_p1 = scmp.lt.s32.totalorder %s2281_s25, 3 }
   0x4   : > { %p398_p2 = pnand %p2094_p0, %p397_p1 }
   0x6   : > { %401 = sbr.rel (%p398_p2) target bundleno = 2495 (0x9bf), region = 72 }
   0xb   : > { %p446_p3 = scmp.lt.s32.totalorder %s2090_s26, 1  ;;  %v470_v7 = vld [vmem:[%s3804_s3] sm:$0xff]  ;;  %vm3819_vm0 = vcmask 130048   ;;  %v471_v9 = vld [vmem:[%s3804_s3 + $0x8] sm:$0xff]  ;;  %v2283_v10 = vmov 0   ;;  %s2284_s29 = smov 113  }
   0xc   : > { %2232 = vset.pattern.permute.xlu1 %v2283_v10  ;;  %2233 = vset.pattern.permute.xlu0 %v2283_v10  ;;  %v467_v13 = vld [vmem:[%s3802_s1 + $0x8] sm:$0xff]  ;;  %v468_v14 = vld [vmem:[%s3803_s2] sm:$0xff]  ;;  %s2285_s14 = smov 112   ;;  %s3817_s15 = smov 127   ;;  %vm1000_vm15 = vcmask 261120  }
   0xd   : > { %s3939_s26 = smov (!%p446_p3, %s2090_s26), 1  ;;  %2234 = vset.pattern.permute.xlu2 %v2283_v10  ;;  %v466_v31 = vld [vmem:[%s3802_s1] sm:$0xff]  ;;  %v469_v48 = vld [vmem:[%s3803_s2 + $0x8] sm:$0xff]  ;;  %s2287_s16 = smov 1  }
   0xe   : > { %s2190_s27 = sshll.u32 %s3939_s26, 5  ;;  %s2288_s17 = smov 15  }
   0xf   : > { %s2378_s30 = scalar_lea.vmem %s3801_s0, %s2190_s27  ;;  %s2289_s18 = smov 16  }
  0x10   : > { %v2381_v0 = vld [vmem:[%s2378_s30 + $0x10] sm:$0xff]  ;;  %v2384_v1 = vld [vmem:[%s2378_s30 + $0x18] sm:$0xff]  ;;  %v2389_v3 = vld [vmem:[%s2378_s30] sm:$0xff]  ;;  %s2290_s19 = smov 17   ;;  %s3815_s20 = smov 111  }
  0x11   : > { %v475_v2 = vadd.f32 %v2384_v1, %v2381_v0  ;;  %v2392_v4 = vld [vmem:[%s2378_s30 + $0x8] sm:$0xff]  ;;  %s455_s23 = scalar_lea.vmem %s3806_s5, %s2190_s27 }
  0x12   : > { %v472_v5 = vadd.f32 %v2392_v4, %v2389_v3 }
  0x13   : > { %476 = vadd.xlane.f32.xlu0 %v475_v2 }
  0x1b   : > { %473 = vadd.xlane.f32.xlu0 %v472_v5 }
  0x86   : > { %v477_v6 = vpop.xlane.xlu0 %476 }
  0x87   : > { %499 = vmatpush.msra.mxu0 %v477_v6 }
  0x8e   : > { %v474_v8 = vpop.xlane.xlu0 %473 }
  0x8f   : > { %500 = vmatpush.msra.mxu0 %v474_v8 }
  0x90   : > { %2101 = vmatmul.msk.f32.vlgmr.msra.gmra.mxu0 %vm3819_vm0, %v470_v7 }
  0x98   : > { %2102 = vmatmul.msk.f32.gmra.mxu0 %vm3819_vm0, %v471_v9 }
 0x10d   : > { %v502_v11 = vpop.f32.mrf.mxu0 }
 0x115   : > { %v505_v12 = vpop.f32.mrf.mxu0 }
 0x116   : > { %515 = vperm.xlu1 %2232, %v505_v12  }
 0x11e   : > { %510 = vperm.xlu1 %2232, %v502_v11  }
 0x126   : > { %596 = vperm.xlu1 %2232, %v467_v13  }
 0x12e   : > { %605 = vperm.xlu1 %2232, %v468_v14  }
 0x188   : > { %v516_v15 = vpop.permute.xlu1 %515 }
 0x189   : > { %v2411_v16 = vsub.f32 %v2381_v0, %v516_v15  ;;  %v2414_v17 = vsub.f32 %v2384_v1, %v516_v15 }
 0x18b   : > { %v524_v18 = vmul.f32 %v2411_v16, %v2411_v16  ;;  %v525_v19 = vmul.f32 %v2414_v17, %v2414_v17 }
 0x18d   : > { %v529_v20 = vadd.f32 %v525_v19, %v524_v18 }
 0x18f   : > { %530 = vadd.xlane.f32.xlu2 %v529_v20 }
 0x190   : > { %v511_v21 = vpop.permute.xlu1 %510 }
 0x191   : > { %v518_v22 = vsub.f32 %v2389_v3, %v511_v21  ;;  %v519_v23 = vsub.f32 %v2392_v4, %v511_v21 }
 0x193   : > { %v522_v24 = vmul.f32 %v518_v22, %v518_v22  ;;  %v523_v25 = vmul.f32 %v519_v23, %v519_v23 }
 0x195   : > { %v526_v26 = vadd.f32 %v523_v25, %v522_v24 }
 0x197   : > { %527 = vadd.xlane.f32.xlu2 %v526_v26 }
 0x198   : > { %v597_v49 = vpop.permute.xlu1 %596 }
 0x1a0   : > { %v606_v56 = vpop.permute.xlu1 %605 }
 0x1af   : > { %591 = vperm.xlu2 %2234, %v466_v31   ;;  %v852_v31 = vld [vmem:[%s455_s23] sm:$0xff] }
 0x202   : > { %v531_v27 = vpop.xlane.xlu2 %530 }
 0x203   : > { %546 = vmatpush.msra.mxu1 %v531_v27  ;;  %v854_v27 = vld [vmem:[%s455_s23 + $0x10] sm:$0xff] }
 0x20a   : > { %v528_v28 = vpop.xlane.xlu2 %527 }
 0x20b   : > { %547 = vmatpush.msra.mxu1 %v528_v28  ;;  %v855_v28 = vld [vmem:[%s455_s23 + $0x18] sm:$0xff] }
 0x20c   : > { %2103 = vmatmul.msk.f32.vlgmr.msra.gmra.mxu1 %vm3819_vm0, %v470_v7 }
 0x212   : > { %v592_v51 = vpop.permute.xlu2 %591 }
 0x214   : > { %2104 = vmatmul.msk.f32.gmra.mxu1 %vm3819_vm0, %v471_v9 }
 0x289   : > { %v549_v29 = vpop.f32.mrf.mxu1 }
 0x28a   : > { %v550_v30 = vadd.f32 1e-05, %v549_v29  ;;  %v853_v29 = vld [vmem:[%s455_s23 + $0x8] sm:$0xff] }
 0x28c   : > { %2235 = vrsqrt.f32 %v550_v30  ;;  %vm561_vm2 = vweird.f32 %v550_v30 }
 0x291   : > { %v552_v32 = vpop.f32.mrf.mxu1 }
 0x292   : > { %v2236_v33 = vpop.eup %2235  ;;  %v553_v34 = vadd.f32 1e-05, %v552_v32 }
 0x293   : > { %v556_v35 = vmul.f32 %v2236_v33, %v550_v30  ;;  %vm562_vm1 = vweird.f32 %v2236_v33 }
 0x294   : > { %2237 = vrsqrt.f32 %v553_v34  ;;  %vm563_vm3 = vmor %vm561_vm2, %vm562_vm1  ;;  %vm571_vm4 = vweird.f32 %v553_v34 }
 0x295   : > { %v557_v36 = vmul.f32 %v2236_v33, %v556_v35 }
 0x297   : > { %v558_v37 = vmul.f32 0.5, %v557_v36 }
 0x299   : > { %v559_v38 = vsub.f32 1.5, %v558_v37 }
 0x29a   : > { %v2238_v39 = vpop.eup %2237 }
 0x29b   : > { %v566_v40 = vmul.f32 %v2238_v39, %v553_v34  ;;  %v560_v41 = vmul.f32 %v2236_v33, %v559_v38  ;;  %vm572_vm5 = vweird.f32 %v2238_v39 }
 0x29c   : > { %vm573_vm6 = vmor %vm571_vm4, %vm572_vm5 }
 0x29d   : > { %v567_v42 = vmul.f32 %v2238_v39, %v566_v40  ;;  %v564_v43 = vsel %vm563_vm3, %v2236_v33, %v560_v41 }
 0x29e   : > { %577 = vperm.xlu0 %2233, %v564_v43  }
 0x29f   : > { %v568_v44 = vmul.f32 0.5, %v567_v42 }
 0x2a1   : > { %v569_v45 = vsub.f32 1.5, %v568_v44 }
 0x2a3   : > { %v570_v46 = vmul.f32 %v2238_v39, %v569_v45  ;;  %v645_v45 = vlaneseq }
 0x2a5   : > { %v574_v47 = vsel %vm573_vm6, %v2238_v39, %v570_v46  ;;  %v2525_v46 = vand.u32 127, %v645_v45 }
 0x2a6   : > { %582 = vperm.xlu1 %2232, %v574_v47  }
 0x2a7   : > { %vm790_vm7 = vcmp.lt.s32.totalorder %v2525_v46, 112  ;;  %vm766_vm8 = vcmp.lt.s32.totalorder %v2525_v46, 113  ;;  %vm742_vm9 = vcmp.lt.s32.totalorder %v2525_v46, 127  ;;  %vm718_vm10 = vcmp.lt.s32.totalorder %v2525_v46, 1 }
 0x2a8   : > { %vm694_vm11 = vcmp.lt.s32.totalorder %v2525_v46, 15  ;;  %vm670_vm12 = vcmp.lt.s32.totalorder %v2525_v46, 16  ;;  %vm647_vm13 = vcmp.lt.s32.totalorder %v2525_v46, 17  ;;  %vm814_vm14 = vcmp.lt.s32.totalorder %v2525_v46, 111 }
 0x2ae   : > { %610 = vperm.xlu1 %2232, %v469_v48  }
 0x310   : > { %v578_v50 = vpop.permute.xlu0 %577 }
 0x311   : > { %v585_v52 = vmul.f32 %v578_v50, %v518_v22  ;;  %v586_v53 = vmul.f32 %v578_v50, %v519_v23  ;;  %v2110_v50 = vld [vmem:[%s3813_s12 + $0xe] sm:$0x3] }
 0x313   : > { %v599_v54 = vmul.f32 %v592_v51, %v585_v52  ;;  %v600_v55 = vmul.f32 %v592_v51, %v586_v53  ;;  %v2533_v51 = vperm.slane %v2110_v50, 1  ;;  %v2535_v52 = vperm.slane %v2110_v50, 0 }
 0x315   : > { %v613_v57 = vadd.f32 %v606_v56, %v599_v54  ;;  %v614_v58 = vadd.f32 %v606_v56, %v600_v55 }
 0x317   : > { %v617_v59 = vmul.f32 0.5, %v613_v57  ;;  %v618_v60 = vmul.f32 0.5, %v614_v58 }
 0x318   : > { %v583_v62 = vpop.permute.xlu1 %582 }
 0x319   : > { %2239 = vtanh.f32 %v617_v59  ;;  %v588_v10 = vmul.f32 %v583_v62, %v2414_v17  ;;  %v587_v14 = vmul.f32 %v583_v62, %v2411_v16 }
 0x31a   : > { %2241 = vtanh.f32 %v618_v60 }
 0x31b   : > { %v602_v12 = vmul.f32 %v597_v49, %v588_v10  ;;  %v601_v17 = vmul.f32 %v597_v49, %v587_v14 }
 0x31f   : > { %v2240_v61 = vpop.eup %2239 }
 0x320   : > { %v2242_v63 = vpop.eup %2241  ;;  %v625_v2 = vadd.f32 1.0, %v2240_v61  ;;  %v611_v11 = vpop.permute.xlu1 %610 }
 0x321   : > { %v626_v5 = vadd.f32 1.0, %v2242_v63  ;;  %v616_v13 = vadd.f32 %v611_v11, %v602_v12  ;;  %v615_v18 = vadd.f32 %v611_v11, %v601_v17  ;;  %v2109_v63 = vld [vmem:[%s3813_s12 + $0xc] sm:$0x3] }
 0x322   : > { %v629_v6 = vmul.f32 0.5, %v625_v2  ;;  %v2556_v10 = vperm.slane %v2109_v63, 0  ;;  %v2560_v12 = vperm.slane %v2109_v63, 1 }
 0x323   : > { %v630_v7 = vmul.f32 0.5, %v626_v5  ;;  %v620_v15 = vmul.f32 0.5, %v616_v13  ;;  %v619_v16 = vmul.f32 0.5, %v615_v18 }
 0x324   : > { %v2430_v8 = vmul.f32 %v629_v6, %v613_v57 }
 0x325   : > { %v2432_v9 = vmul.f32 %v630_v7, %v614_v58  ;;  %2243 = vtanh.f32 %v620_v15  ;;  %v2108_v7 = vld [vmem:[%s3813_s12 + $0xa] sm:$0x3] }
 0x326   : > { %758 = vrot.lane.b32.xlu1 %v2430_v8, %s2284_s29  ;;  %782 = vrot.lane.b32.xlu2 %v2430_v8, %s2285_s14  ;;  %2245 = vtanh.f32 %v619_v16  ;;  %v2565_v14 = vperm.slane %v2108_v7, 0 }
 0x327   : > { %762 = vrot.lane.b32.xlu0 %v2432_v9, %s2284_s29 }
 0x32b   : > { %v2244_v19 = vpop.eup %2243 }
 0x32c   : > { %v628_v20 = vadd.f32 1.0, %v2244_v19  ;;  %v2246_v21 = vpop.eup %2245 }
 0x32d   : > { %v627_v23 = vadd.f32 1.0, %v2246_v21 }
 0x32e   : > { %738 = vrot.lane.b32.xlu1 %v2432_v9, %s3817_s15  ;;  %786 = vrot.lane.b32.xlu2 %v2432_v9, %s2285_s14  ;;  %v632_v22 = vmul.f32 0.5, %v628_v20 }
 0x32f   : > { %710 = vrot.lane.b32.xlu0 %v2430_v8, %s2287_s16  ;;  %v631_v25 = vmul.f32 0.5, %v627_v23 }
 0x330   : > { %v2460_v24 = vmul.f32 %v632_v22, %v616_v13 }
 0x331   : > { %v2468_v26 = vmul.f32 %v631_v25, %v615_v18 }
 0x336   : > { %686 = vrot.lane.b32.xlu1 %v2430_v8, %s2288_s17  ;;  %734 = vrot.lane.b32.xlu2 %v2430_v8, %s3817_s15 }
 0x337   : > { %690 = vrot.lane.b32.xlu0 %v2432_v9, %s2288_s17 }
 0x33e   : > { %666 = vrot.lane.b32.xlu1 %v2432_v9, %s2289_s18  ;;  %714 = vrot.lane.b32.xlu2 %v2432_v9, %s2287_s16 }
 0x33f   : > { %637 = vrot.lane.b32.xlu0 %v2430_v8, %s2290_s19 }
 0x346   : > { %806 = vrot.lane.b32.xlu1 %v2430_v8, %s3815_s20  ;;  %662 = vrot.lane.b32.xlu2 %v2430_v8, %s2289_s18 }
 0x347   : > { %788 = vrot.lane.b32.xlu0 %v2460_v24, %s2285_s14 }
 0x34e   : > { %641 = vrot.lane.b32.xlu2 %v2432_v9, %s2290_s19  ;;  %784 = vrot.lane.b32.xlu1 %v2468_v26, %s2285_s14 }
 0x34f   : > { %736 = vrot.lane.b32.xlu0 %v2468_v26, %s3817_s15 }
 0x356   : > { %760 = vrot.lane.b32.xlu2 %v2468_v26, %s2284_s29  ;;  %764 = vrot.lane.b32.xlu1 %v2460_v24, %s2284_s29 }
 0x357   : > { %716 = vrot.lane.b32.xlu0 %v2460_v24, %s2287_s16 }
 0x35e   : > { %740 = vrot.lane.b32.xlu2 %v2460_v24, %s3817_s15  ;;  %712 = vrot.lane.b32.xlu1 %v2468_v26, %s2287_s16  ;;  %s3863_s15 = smov 127  }
 0x35f   : > { %664 = vrot.lane.b32.xlu0 %v2468_v26, %s2289_s18 }
 0x366   : > { %688 = vrot.lane.b32.xlu2 %v2468_v26, %s2288_s17  ;;  %692 = vrot.lane.b32.xlu1 %v2460_v24, %s2288_s17 }
 0x367   : > { %643 = vrot.lane.b32.xlu0 %v2460_v24, %s2290_s19 }
 0x36e   : > { %668 = vrot.lane.b32.xlu2 %v2460_v24, %s2289_s18  ;;  %639 = vrot.lane.b32.xlu1 %v2468_v26, %s2290_s19 }
 0x36f   : > { %810 = vrot.lane.b32.xlu0 %v2432_v9, %s3815_s20 }
 0x376   : > { %808 = vrot.lane.b32.xlu2 %v2468_v26, %s3815_s20  ;;  %812 = vrot.lane.b32.xlu1 %v2460_v24, %s3815_s20  ;;  %s3864_s20 = smov 111  }
 0x377   : > { %868 = vperm.xlu0 %2233, %v854_v27  }
 0x37e   : > { %873 = vperm.xlu2 %2234, %v855_v28   ;;  %863 = vperm.xlu1 %2232, %v853_v29   ;;  %v2581_v28 = vperm.slane %v2108_v7, 1 }
 0x380   : > { %v783_v30 = vpop.permute.xlu2 %782  ;;  %3853 = vst [vmem:[#allocation2_spill] sm:$0xff] %v2581_v28 }
 0x386   : > { %858 = vperm.xlu2 %2234, %v852_v31  }
 0x388   : > { %v787_v32 = vpop.permute.xlu2 %786 }
 0x389   : > { %v793_v53 = vsel %vm790_vm7, %v787_v32, %v783_v30  ;;  %v791_v54 = vsel %vm790_vm7, %v783_v30, %v787_v32 }
 0x38a   : > { %v802_v60 = vmul.f32 %v2535_v52, %v791_v54  ;;  %v803_v62 = vmul.f32 %v2533_v51, %v793_v53 }
 0x390   : > { %v735_v33 = vpop.permute.xlu2 %734 }
 0x398   : > { %v759_v34 = vpop.permute.xlu1 %758  ;;  %v2509_v36 = vpop.permute.xlu2 %714 }
 0x399   : > { %v763_v35 = vpop.permute.xlu0 %762 }
 0x39a   : > { %v767_v11 = vsel %vm766_vm8, %v759_v34, %v763_v35  ;;  %v769_v13 = vsel %vm766_vm8, %v763_v35, %v759_v34 }
 0x39b   : > { %v778_v20 = vmul.f32 %v2556_v10, %v767_v11  ;;  %v779_v25 = vmul.f32 %v2560_v12, %v769_v13 }
 0x3a0   : > { %v739_v37 = vpop.permute.xlu1 %738  ;;  %v2513_v39 = vpop.permute.xlu2 %662 }
 0x3a1   : > { %v2511_v38 = vpop.permute.xlu0 %710  ;;  %v743_v27 = vsel %vm742_vm9, %v735_v33, %v739_v37  ;;  %v745_v29 = vsel %vm742_vm9, %v739_v37, %v735_v33 }
 0x3a2   : > { %v754_v45 = vmul.f32 %v2565_v14, %v743_v27  ;;  %v652_v27 = vld [vmem:[%s3813_s12] sm:$0x3] }
 0x3a8   : > { %v2515_v40 = vpop.permute.xlu1 %686  ;;  %v2519_v42 = vpop.permute.xlu2 %641 }
 0x3a9   : > { %v2517_v41 = vpop.permute.xlu0 %690 }
 0x3b0   : > { %v2521_v43 = vpop.permute.xlu1 %666  ;;  %v761_v49 = vpop.permute.xlu2 %760 }
 0x3b1   : > { %v2523_v44 = vpop.permute.xlu0 %637 }
 0x3b8   : > { %v2527_v47 = vpop.permute.xlu1 %806  ;;  %v741_v2 = vpop.permute.xlu2 %740 }
 0x3b9   : > { %v789_v48 = vpop.permute.xlu0 %788 }
 0x3c0   : > { %v785_v55 = vpop.permute.xlu1 %784  ;;  %v689_v35 = vpop.permute.xlu2 %688 }
 0x3c1   : > { %v737_v56 = vpop.permute.xlu0 %736  ;;  %v792_v57 = vsel %vm790_vm7, %v785_v55, %v789_v48  ;;  %v794_v58 = vsel %vm790_vm7, %v789_v48, %v785_v55  ;;  %v2107_v48 = vld [vmem:[%s3813_s12 + $0x6] sm:$0x3]  ;;  %v2106_v55 = vld [vmem:[%s3813_s12 + $0x4] sm:$0x3] }
 0x3c2   : > { %v805_v59 = vmul.f32 %v2533_v51, %v794_v58  ;;  %v804_v61 = vmul.f32 %v2535_v52, %v792_v57  ;;  %v744_v17 = vsel %vm742_vm9, %v737_v56, %v741_v2  ;;  %v746_v21 = vsel %vm742_vm9, %v741_v2, %v737_v56 }
 0x3c3   : > { %v756_v30 = vmul.f32 %v2565_v14, %v744_v17  ;;  %v757_v34 = vmul.f32 %v2581_v28, %v746_v21  ;;  %v2599_v56 = vperm.slane %v2107_v48, 0  ;;  %v721_v58 = vsel %vm718_vm10, %v2509_v36, %v2511_v38 }
 0x3c4   : > { %v844_v5 = vpack.c.bf16 %v804_v61, %v802_v60  ;;  %v845_v6 = vpack.c.bf16 %v805_v59, %v803_v62  ;;  %v2607_v59 = vperm.slane %v2107_v48, 1  ;;  %v719_v60 = vsel %vm718_vm10, %v2511_v38, %v2509_v36 }
 0x3c5   : > { %v840_v37 = vpack.c.bf16 %v756_v30, %v754_v45  ;;  %v838_v62 = vpack.c.bf16 %v2468_v26, %v2430_v8  ;;  %v2616_v63 = vperm.slane %v2106_v55, 0  ;;  %v697_v2 = vsel %vm694_vm11, %v2517_v41, %v2515_v40 }
 0x3c6   : > { %900 = vmatpush.bf16.msra.mxu2 %v844_v5  ;;  %938 = vmatpush.bf16.msrb.mxu0 %v845_v6  ;;  %v2105_v5 = vld [vmem:[%s3813_s12 + $0x2] sm:$0x3]  ;;  %v839_v36 = vpack.c.bf16 %v2460_v24, %v2432_v9  ;;  %v2628_v38 = vperm.slane %v2106_v55, 1  ;;  %v730_v8 = vmul.f32 %v2599_v56, %v721_v58  ;;  %v695_v26 = vsel %vm694_vm11, %v2515_v40, %v2517_v41 }
 0x3c7   : > { %v731_v7 = vmul.f32 %v2607_v59, %v719_v60  ;;  %v2637_v13 = vperm.slane %v2105_v5, 0  ;;  %v706_v24 = vmul.f32 %v2616_v63, %v697_v2  ;;  %v2669_v45 = vperm.slane %v652_v27, 1  ;;  %v2194_v60 = vld [vmem:[%s3805_s4 + $0x4] sm:$0xf0] }
 0x3c8   : > { %v765_v15 = vpop.permute.xlu1 %764  ;;  %v669_v11 = vpop.permute.xlu2 %668 }
 0x3c9   : > { %v717_v18 = vpop.permute.xlu0 %716  ;;  %v768_v16 = vsel %vm766_vm8, %v761_v49, %v765_v15  ;;  %v770_v19 = vsel %vm766_vm8, %v765_v15, %v761_v49  ;;  %v755_v49 = vmul.f32 %v2581_v28, %v745_v29  ;;  %v671_v29 = vsel %vm670_vm12, %v2513_v39, %v2521_v43 }
 0x3ca   : > { %v780_v22 = vmul.f32 %v2556_v10, %v768_v16  ;;  %v781_v23 = vmul.f32 %v2560_v12, %v770_v19 }
 0x3cb   : > { %v841_v54 = vpack.c.bf16 %v757_v34, %v755_v49  ;;  %v648_v49 = vsel %vm647_vm13, %v2523_v44, %v2519_v42 }
 0x3cc   : > { %v842_v31 = vpack.c.bf16 %v780_v22, %v778_v20  ;;  %v843_v32 = vpack.c.bf16 %v781_v23, %v779_v25  ;;  %v707_v22 = vmul.f32 %v2628_v38, %v695_v26  ;;  %v673_v23 = vsel %vm670_vm12, %v2521_v43, %v2513_v39 }
 0x3cd   : > { %v2656_v25 = vperm.slane %v2105_v5, 1  ;;  %v682_v48 = vmul.f32 %v2637_v13, %v673_v23  ;;  %v650_v39 = vsel %vm647_vm13, %v2519_v42, %v2523_v44  ;;  %v659_v42 = vmul.f32 %v2669_v45, %v648_v49  ;;  %v2114_v44 = vld [vmem:[%s3805_s4] sm:$0xf]  ;;  %v2196_v23 = vld [vmem:[%s3805_s4 + $0x14] sm:$0xf0] }
 0x3ce   : > { %901 = vmatpush.bf16.msra.mxu2 %v842_v31  ;;  %939 = vmatpush.bf16.msrb.mxu0 %v843_v32 }
 0x3cf   : > { %v683_v43 = vmul.f32 %v2656_v25, %v671_v29  ;;  %v2195_v29 = vld [vmem:[%s3805_s4 + $0x14] sm:$0xf] }
 0x3d0   : > { %v713_v33 = vpop.permute.xlu1 %712 }
 0x3d1   : > { %v665_v50 = vpop.permute.xlu0 %664  ;;  %v722_v53 = vsel %vm718_vm10, %v717_v18, %v713_v33  ;;  %v720_v57 = vsel %vm718_vm10, %v713_v33, %v717_v18 }
 0x3d2   : > { %902 = vmatpush.bf16.msra.mxu2 %v840_v37  ;;  %940 = vmatpush.bf16.msrb.mxu0 %v841_v54  ;;  %v732_v61 = vmul.f32 %v2599_v56, %v722_v53  ;;  %v733_v6 = vmul.f32 %v2607_v59, %v720_v57  ;;  %v674_v17 = vsel %vm670_vm12, %v669_v11, %v665_v50 }
 0x3d3   : > { %v672_v16 = vsel %vm670_vm12, %v665_v50, %v669_v11  ;;  %v684_v30 = vmul.f32 %v2637_v13, %v674_v17  ;;  %v809_v11 = vpop.permute.xlu2 %808 }
 0x3d4   : > { %v836_v9 = vpack.c.bf16 %v732_v61, %v730_v8  ;;  %v837_v41 = vpack.c.bf16 %v733_v6, %v731_v7  ;;  %v685_v34 = vmul.f32 %v2656_v25, %v672_v16  ;;  %v2111_v61 = vld [vmem:[%s3813_s12 + $0x10] sm:$0x3]  ;;  %v2115_v6 = vor.u32 %v2194_v60, %v2114_v44  ;;  %v2116_v16 = vld [vmem:[%s3805_s4 + $0x8] sm:$0xf0] }
 0x3d5   : > { %v832_v37 = vpack.c.bf16 %v684_v30, %v682_v48  ;;  %v2701_v8 = vperm.slane %v2111_v61, 0  ;;  %v2124_v30 = vld [vmem:[%s3805_s4 + $0x18] sm:$0xf0] }
 0x3d6   : > { %903 = vmatpush.bf16.msra.mxu2 %v838_v62  ;;  %941 = vmatpush.bf16.msrb.mxu0 %v839_v36  ;;  %v833_v54 = vpack.c.bf16 %v685_v34, %v683_v43  ;;  %v2699_v36 = vperm.slane %v2111_v61, 1 }
 0x3d7   : > { %3855 = vst [vmem:[#allocation4_spill] sm:$0xff] %v2701_v8 }
 0x3d8   : > { %v693_v15 = vpop.permute.xlu1 %692  ;;  %3854 = vst [vmem:[#allocation3_spill] sm:$0xff] %v2699_v36 }
 0x3d9   : > { %v696_v18 = vsel %vm694_vm11, %v689_v35, %v693_v15  ;;  %v698_v40 = vsel %vm694_vm11, %v693_v15, %v689_v35  ;;  %v644_v19 = vpop.permute.xlu0 %643  ;;  %v2667_v35 = vperm.slane %v652_v27, 0 }
 0x3da   : > { %v708_v20 = vmul.f32 %v2616_v63, %v698_v40  ;;  %v709_v21 = vmul.f32 %v2628_v38, %v696_v18  ;;  %904 = vmatpush.bf16.msra.mxu2 %v836_v9  ;;  %942 = vmatpush.bf16.msrb.mxu0 %v837_v41 }
 0x3db   : > { %v658_v58 = vmul.f32 %v2667_v35, %v650_v39 }
 0x3dc   : > { %v834_v31 = vpack.c.bf16 %v708_v20, %v706_v24  ;;  %v835_v32 = vpack.c.bf16 %v709_v21, %v707_v22  ;;  %v2122_v22 = vld [vmem:[%s3805_s4 + $0x10] sm:$0xf] }
 0x3dd   : > { %v2123_v27 = vor.u32 %v2196_v23, %v2122_v22 }
 0x3de   : > { %905 = vmatpush.bf16.msra.mxu2 %v834_v31  ;;  %943 = vmatpush.bf16.msrb.mxu0 %v835_v32  ;;  %v2127_v31 = vor.u32 %v2195_v29, %v2124_v30 }
 0x3e0   : > { %v640_v33 = vpop.permute.xlu1 %639 }
 0x3e1   : > { %v649_v50 = vsel %vm647_vm13, %v640_v33, %v644_v19  ;;  %v651_v53 = vsel %vm647_vm13, %v644_v19, %v640_v33  ;;  %v811_v62 = vpop.permute.xlu0 %810  ;;  %v874_v33 = vpop.permute.xlu2 %873 }
 0x3e2   : > { %v660_v55 = vmul.f32 %v2667_v35, %v651_v53  ;;  %v661_v57 = vmul.f32 %v2669_v45, %v649_v50  ;;  %906 = vmatpush.bf16.msra.mxu2 %v832_v37  ;;  %944 = vmatpush.bf16.msrb.mxu0 %v833_v54  ;;  %v815_v26 = vsel %vm814_vm14, %v2527_v47, %v811_v62 }
 0x3e3   : > { %v817_v7 = vsel %vm814_vm14, %v811_v62, %v2527_v47  ;;  %v826_v40 = vmul.f32 %v2701_v8, %v815_v26  ;;  %v2193_v47 = vld [vmem:[%s3805_s4 + $0x4] sm:$0xf] }
 0x3e4   : > { %v830_v2 = vpack.c.bf16 %v660_v55, %v658_v58  ;;  %v831_v5 = vpack.c.bf16 %v661_v57, %v659_v42  ;;  %v827_v17 = vmul.f32 %v2699_v36, %v817_v7  ;;  %v2119_v21 = vor.u32 %v2193_v47, %v2116_v16 }
 0x3e6   : > { %907 = vmatpush.bf16.msra.mxu2 %v830_v2  ;;  %945 = vmatpush.bf16.msrb.mxu0 %v831_v5 }
 0x3e8   : > { %v813_v15 = vpop.permute.xlu1 %812 }
 0x3e9   : > { %v816_v9 = vsel %vm814_vm14, %v809_v11, %v813_v15  ;;  %v818_v24 = vsel %vm814_vm14, %v813_v15, %v809_v11  ;;  %908 = vmatmul.bf16.vlgmr.msra.gmra.mxu2 %v2115_v6  ;;  %946 = vmatmul.bf16.vlgmr.msrb.gmra.mxu0 %v2115_v6  ;;  %v859_v61 = vpop.permute.xlu2 %858  ;;  %v869_v5 = vpop.permute.xlu0 %868 }
 0x3ea   : > { %v829_v18 = vmul.f32 %v2699_v36, %v818_v24  ;;  %v828_v41 = vmul.f32 %v2701_v8, %v816_v9 }
 0x3ec   : > { %v846_v19 = vpack.c.bf16 %v828_v41, %v826_v40  ;;  %v847_v20 = vpack.c.bf16 %v829_v18, %v827_v17 }
 0x3ee   : > { %926 = vmatpush.bf16.msra.mxu3 %v846_v19  ;;  %964 = vmatpush.bf16.msrb.mxu1 %v847_v20 }
 0x3f0   : > { %v864_v50 = vpop.permute.xlu1 %863 }
 0x3f1   : > { %2128 = vmatmul.msk.bf16.vlgmr.msra.gmra.mxu3 %vm3819_vm0, %v2119_v21  ;;  %2130 = vmatmul.msk.bf16.vlgmr.msrb.gmra.mxu1 %vm3819_vm0, %v2119_v21 }
 0x3f9   : > { %913 = vmatmul.bf16.gmra.mxu2 %v2123_v27  ;;  %951 = vmatmul.bf16.gmra.mxu0 %v2123_v27 }
 0x401   : > { %2129 = vmatmul.msk.bf16.gmra.mxu3 %vm3819_vm0, %v2127_v31  ;;  %2131 = vmatmul.msk.bf16.gmra.mxu1 %vm3819_vm0, %v2127_v31 }
 0x466   : > { %v947_v32 = vpop.f32.mrf.mxu0 }
 0x467   : > { %v948_v6 = vadd.f32 %v947_v32, %v859_v61  ;;  %v2748_v32 = vld [vmem:[%s3809_s8] sm:$0xff] }
 0x46c   : > { %v909_v34 = vpop.f32.mrf.mxu2 }
 0x46d   : > { %v910_v2 = vadd.f32 %v909_v34, %v859_v61  ;;  %v976_v61 = vld [vmem:[%s3807_s6] sm:$0xff] }
 0x46e   : > { %v966_v48 = vpop.f32.mrf.mxu1  ;;  %v949_v49 = vpop.f32.mrf.mxu0 }
 0x46f   : > { %v950_v53 = vadd.f32 %v949_v49, %v864_v50  ;;  %v2741_v9 = vadd.f32 %v966_v48, %v948_v6  ;;  %v2755_v48 = vld [vmem:[%s3809_s8 + $0x8] sm:$0xff]  ;;  %v2762_v49 = vld [vmem:[%s3809_s8 + $0x10] sm:$0xff] }
 0x470   : > { %v982_v6 = vld [vmem:[%s3808_s7 + $0x10] sm:$0xff] }
 0x474   : > { %v911_v39 = vpop.f32.mrf.mxu2  ;;  %v928_v43 = vpop.f32.mrf.mxu3 }
 0x475   : > { %v912_v54 = vadd.f32 %v911_v39, %v864_v50  ;;  %v2739_v26 = vadd.f32 %v928_v43, %v910_v2  ;;  %v2769_v39 = vld [vmem:[%s3809_s8 + $0x18] sm:$0xff] }
 0x476   : > { %v968_v37 = vpop.f32.mrf.mxu1  ;;  %v952_v42 = vpop.f32.mrf.mxu0 }
 0x477   : > { %v969_v57 = vadd.f32 %v968_v37, %v950_v53  ;;  %v953_v7 = vadd.f32 %v952_v42, %v869_v5  ;;  %v988_v40 = vadd.f32 %v2741_v9, %v2739_v26 }
 0x47c   : > { %v930_v55 = vpop.f32.mrf.mxu3  ;;  %v914_v44 = vpop.f32.mrf.mxu2 }
 0x47d   : > { %v931_v58 = vadd.f32 %v930_v55, %v912_v54  ;;  %v915_v11 = vadd.f32 %v914_v44, %v869_v5 }
 0x47e   : > { %v971_v62 = vpop.f32.mrf.mxu1  ;;  %v954_v41 = vpop.f32.mrf.mxu0 }
 0x47f   : > { %v991_v60 = vadd.f32 %v969_v57, %v931_v58  ;;  %v972_v24 = vadd.f32 %v971_v62, %v953_v7  ;;  %v955_v19 = vadd.f32 %v954_v41, %v874_v33 }
 0x481   : > { %992 = vadd.xlane.f32.xlu2 %v991_v60 }
 0x484   : > { %v933_v15 = vpop.f32.mrf.mxu3  ;;  %v916_v47 = vpop.f32.mrf.mxu2 }
 0x485   : > { %v934_v17 = vadd.f32 %v933_v15, %v915_v11  ;;  %v917_v20 = vadd.f32 %v916_v47, %v874_v33 }
 0x486   : > { %v973_v16 = vpop.f32.mrf.mxu1 }
 0x487   : > { %v994_v18 = vadd.f32 %v972_v24, %v934_v17  ;;  %v974_v22 = vadd.f32 %v973_v16, %v955_v19 }
 0x489   : > { %995 = vadd.xlane.f32.xlu1 %v994_v18  ;;  %989 = vadd.xlane.f32.xlu2 %v988_v40  ;;  %v980_v40 = vld [vmem:[%s3808_s7] sm:$0xff] }
 0x48c   : > { %v935_v21 = vpop.f32.mrf.mxu3 }
 0x48d   : > { %v936_v23 = vadd.f32 %v935_v21, %v917_v20 }
 0x48f   : > { %v997_v27 = vadd.f32 %v974_v22, %v936_v23 }
 0x491   : > { %998 = vadd.xlane.f32.xlu0 %v997_v27  ;;  %v979_v27 = vld [vmem:[%s3807_s6 + $0x18] sm:$0xff] }
 0x4f4   : > { %v993_v29 = vpop.xlane.xlu2 %992 }
 0x4fc   : > { %v996_v31 = vpop.xlane.xlu1 %995  ;;  %v990_v34 = vpop.xlane.xlu2 %989 }
 0x504   : > { %v999_v30 = vpop.xlane.xlu0 %998 }
 0x505   : > { %1025 = vmatpush.msrb.mxu3 %v999_v30 }
 0x507   : > { %1026 = vmatpush.msrb.mxu3 %v996_v31 }
 0x509   : > { %1027 = vmatpush.msrb.mxu3 %v993_v29 }
 0x50b   : > { %1028 = vmatpush.msrb.mxu3 %v990_v34 }
 0x50c   : > { %2132 = vmatmul.msk.f32.vlgmr.msrb.gmra.mxu3 %vm1000_vm15, %v2748_v32 }
 0x514   : > { %2133 = vmatmul.msk.f32.gmra.mxu3 %vm1000_vm15, %v2755_v48 }
 0x51c   : > { %2134 = vmatmul.msk.f32.gmra.mxu3 %vm1000_vm15, %v2762_v49 }
 0x524   : > { %2135 = vmatmul.msk.f32.gmra.mxu3 %vm1000_vm15, %v2769_v39 }
 0x58f   : > { %v1030_v43 = vpop.f32.mrf.mxu3 }
 0x597   : > { %v1033_v33 = vpop.f32.mrf.mxu3 }
 0x598   : > { %1049 = vperm.xlu2 %2234, %v1033_v33  }
 0x59f   : > { %v1036_v37 = vpop.f32.mrf.mxu3 }
 0x5a0   : > { %1054 = vperm.xlu1 %2232, %v1036_v37  }
 0x5a7   : > { %v1039_v50 = vpop.f32.mrf.mxu3 }
 0x5a8   : > { %1059 = vperm.xlu0 %2233, %v1039_v50  }
 0x5b0   : > { %1044 = vperm.xlu0 %2233, %v1030_v43  }
 0x5f2   : > { %v1050_v53 = vpop.permute.xlu2 %1049 }
 0x5f3   : > { %v2773_v54 = vsub.f32 %v931_v58, %v1050_v53  ;;  %v2775_v55 = vsub.f32 %v969_v57, %v1050_v53 }
 0x5f5   : > { %v1072_v42 = vmul.f32 %v2773_v54, %v2773_v54  ;;  %v1073_v44 = vmul.f32 %v2775_v55, %v2775_v55 }
 0x5f7   : > { %v1081_v60 = vadd.f32 %v1073_v44, %v1072_v42 }
 0x5f9   : > { %1082 = vadd.xlane.f32.xlu2 %v1081_v60 }
 0x611   : > { %1189 = vperm.xlu2 %2234, %v976_v61  }
 0x612   : > { %v1055_v62 = vpop.permute.xlu1 %1054 }
 0x613   : > { %v2784_v2 = vsub.f32 %v934_v17, %v1055_v62  ;;  %v2786_v58 = vsub.f32 %v972_v24, %v1055_v62 }
 0x615   : > { %v1074_v57 = vmul.f32 %v2784_v2, %v2784_v2  ;;  %v1075_v5 = vmul.f32 %v2786_v58, %v2786_v58 }
 0x617   : > { %v1084_v7 = vadd.f32 %v1075_v5, %v1074_v57 }
 0x619   : > { %1227 = vperm.xlu2 %2234, %v982_v6   ;;  %1085 = vadd.xlane.f32.xlu0 %v1084_v7 }
 0x61a   : > { %v1060_v11 = vpop.permute.xlu0 %1059 }
 0x61b   : > { %v2795_v15 = vsub.f32 %v936_v23, %v1060_v11  ;;  %v2797_v17 = vsub.f32 %v974_v22, %v1060_v11  ;;  %v978_v23 = vld [vmem:[%s3807_s6 + $0x10] sm:$0xff] }
 0x61d   : > { %v1076_v24 = vmul.f32 %v2795_v15, %v2795_v15  ;;  %v1077_v18 = vmul.f32 %v2797_v17, %v2797_v17 }
 0x61f   : > { %v1087_v41 = vadd.f32 %v1077_v18, %v1076_v24 }
 0x621   : > { %1217 = vperm.xlu2 %2234, %v980_v40   ;;  %1088 = vadd.xlane.f32.xlu1 %v1087_v41 }
 0x622   : > { %v1045_v47 = vpop.permute.xlu0 %1044 }
 0x623   : > { %v2807_v16 = vsub.f32 %v2739_v26, %v1045_v47  ;;  %v2810_v19 = vsub.f32 %v2741_v9, %v1045_v47  ;;  %v983_v26 = vld [vmem:[%s3808_s7 + $0x18] sm:$0xff]  ;;  %v981_v9 = vld [vmem:[%s3808_s7 + $0x8] sm:$0xff] }
 0x625   : > { %v1070_v20 = vmul.f32 %v2807_v16, %v2807_v16  ;;  %v1071_v21 = vmul.f32 %v2810_v19, %v2810_v19 }
 0x627   : > { %v1078_v22 = vadd.f32 %v1071_v21, %v1070_v20 }
 0x629   : > { %1079 = vadd.xlane.f32.xlu1 %v1078_v22  ;;  %1853 = vrot.lane.b32.xlu2 %v2389_v3, %s2285_s14 }
 0x62d   : > { %1199 = vperm.xlu0 %2233, %v978_v23  }
 0x631   : > { %1859 = vrot.lane.b32.xlu2 %v2384_v1, %s2285_s14  ;;  %v977_v1 = vld [vmem:[%s3807_s6 + $0x8] sm:$0xff] }
 0x635   : > { %1232 = vperm.xlu0 %2233, %v983_v26  }
 0x63d   : > { %1222 = vperm.xlu0 %2233, %v981_v9  }
 0x642   : > { %1204 = vperm.xlu1 %2232, %v979_v27  }
 0x645   : > { %1855 = vrot.lane.b32.xlu0 %v2381_v0, %s2285_s14 }
 0x64a   : > { %1194 = vperm.xlu1 %2232, %v977_v1  }
 0x64d   : > { %1837 = vrot.lane.b32.xlu0 %v2389_v3, %s2284_s29 }
 0x652   : > { %1857 = vrot.lane.b32.xlu1 %v2392_v4, %s2285_s14 }
 0x66c   : > { %v1083_v31 = vpop.xlane.xlu2 %1082 }
 0x68c   : > { %v1086_v30 = vpop.xlane.xlu0 %1085 }
 0x694   : > { %v1089_v29 = vpop.xlane.xlu1 %1088 }
 0x695   : > { %1102 = vmatpush.msra.mxu1 %v1089_v29 }
 0x697   : > { %1103 = vmatpush.msra.mxu1 %v1086_v30  ;;  %v1190_v30 = vpop.permute.xlu2 %1189 }
 0x699   : > { %1104 = vmatpush.msra.mxu1 %v1083_v31 }
 0x69c   : > { %v1080_v34 = vpop.xlane.xlu1 %1079 }
 0x69d   : > { %1105 = vmatpush.msra.mxu1 %v1080_v34 }
 0x69e   : > { %2136 = vmatmul.msk.f32.vlgmr.msra.gmra.mxu1 %vm1000_vm15, %v2748_v32 }
 0x69f   : > { %v2849_v31 = vpop.permute.xlu2 %1227  ;;  %v2851_v34 = vpop.permute.xlu0 %1199 }
 0x6a6   : > { %2137 = vmatmul.msk.f32.gmra.mxu1 %vm1000_vm15, %v2755_v48 }
 0x6ae   : > { %2138 = vmatmul.msk.f32.gmra.mxu1 %vm1000_vm15, %v2762_v49 }
 0x6b6   : > { %2139 = vmatmul.msk.f32.gmra.mxu1 %vm1000_vm15, %v2769_v39 }
 0x71b   : > { %v1107_v0 = vpop.f32.mrf.mxu1 }
 0x71c   : > { %v1108_v3 = vadd.f32 1e-05, %v1107_v0  ;;  %v2853_v0 = vpop.permute.xlu1 %1204 }
 0x71e   : > { %2247 = vrsqrt.f32 %v1108_v3  ;;  %vm1125_vm2 = vweird.f32 %v1108_v3 }
 0x723   : > { %v1110_v4 = vpop.f32.mrf.mxu1 }
 0x724   : > { %v2248_v43 = vpop.eup %2247  ;;  %v1111_v33 = vadd.f32 1e-05, %v1110_v4  ;;  %v2855_v4 = vpop.permute.xlu0 %1232 }
 0x725   : > { %v1120_v37 = vmul.f32 %v2248_v43, %v1108_v3  ;;  %vm1126_vm1 = vweird.f32 %v2248_v43  ;;  %v1218_v3 = vpop.permute.xlu2 %1217 }
 0x726   : > { %2249 = vrsqrt.f32 %v1111_v33  ;;  %vm1127_vm3 = vmor %vm1125_vm2, %vm1126_vm1  ;;  %vm1135_vm4 = vweird.f32 %v1111_v33 }
 0x727   : > { %v1121_v50 = vmul.f32 %v2248_v43, %v1120_v37 }
 0x729   : > { %v1122_v53 = vmul.f32 0.5, %v1121_v50 }
 0x72b   : > { %v1123_v32 = vsub.f32 1.5, %v1122_v53  ;;  %v1113_v42 = vpop.f32.mrf.mxu1 }
 0x72c   : > { %v2250_v48 = vpop.eup %2249  ;;  %v1114_v44 = vadd.f32 1e-05, %v1113_v42  ;;  %v1223_v37 = vpop.permute.xlu0 %1222 }
 0x72d   : > { %v1130_v60 = vmul.f32 %v2250_v48, %v1111_v33  ;;  %v1124_v49 = vmul.f32 %v2248_v43, %v1123_v32  ;;  %vm1136_vm5 = vweird.f32 %v2250_v48  ;;  %v1854_v33 = vpop.permute.xlu2 %1853 }
 0x72e   : > { %2251 = vrsqrt.f32 %v1114_v44  ;;  %vm1137_vm6 = vmor %vm1135_vm4, %vm1136_vm5  ;;  %vm1145_vm0 = vweird.f32 %v1114_v44 }
 0x72f   : > { %v1131_v39 = vmul.f32 %v2250_v48, %v1130_v60  ;;  %v1128_v61 = vsel %vm1127_vm3, %v2248_v43, %v1124_v49  ;;  %v1195_v43 = vpop.permute.xlu1 %1194 }
 0x730   : > { %1161 = vperm.xlu0 %2233, %v1128_v61  }
 0x731   : > { %v1132_v62 = vmul.f32 0.5, %v1131_v39 }
 0x733   : > { %v1133_v57 = vsub.f32 1.5, %v1132_v62  ;;  %v1116_v5 = vpop.f32.mrf.mxu1 }
 0x734   : > { %v2252_v6 = vpop.eup %2251  ;;  %v1117_v7 = vadd.f32 1e-05, %v1116_v5  ;;  %v1856_v60 = vpop.permute.xlu0 %1855 }
 0x735   : > { %v1140_v11 = vmul.f32 %v2252_v6, %v1114_v44  ;;  %v1134_v24 = vmul.f32 %v2250_v48, %v1133_v57  ;;  %vm1146_vm1 = vweird.f32 %v2252_v6  ;;  %v1860_v42 = vpop.permute.xlu2 %1859 }
 0x736   : > { %2253 = vrsqrt.f32 %v1117_v7  ;;  %vm1147_vm2 = vmor %vm1145_vm0, %vm1146_vm1  ;;  %vm1155_vm3 = vweird.f32 %v1117_v7  ;;  %v1862_v49 = vsel %vm790_vm7, %v1856_v60, %v1860_v42  ;;  %v1864_v39 = vsel %vm790_vm7, %v1860_v42, %v1856_v60 }
 0x737   : > { %v1141_v18 = vmul.f32 %v2252_v6, %v1140_v11  ;;  %v1138_v40 = vsel %vm1137_vm6, %v2250_v48, %v1134_v24  ;;  %v1858_v50 = vpop.permute.xlu1 %1857  ;;  %v2872_v61 = vmul.f32 %v1862_v49, %v2535_v52  ;;  %v2875_v62 = vmul.f32 %v1864_v39, %v2533_v51 }
 0x738   : > { %1166 = vperm.xlu2 %2234, %v1138_v40   ;;  %v1861_v53 = vsel %vm790_vm7, %v1854_v33, %v1858_v50  ;;  %v1863_v32 = vsel %vm790_vm7, %v1858_v50, %v1854_v33  ;;  %vm3934_vm0 = vcmask 130048  }
 0x739   : > { %v1142_v41 = vmul.f32 0.5, %v1141_v18  ;;  %v2862_v48 = vmul.f32 %v1861_v53, %v2535_v52  ;;  %v2865_v44 = vmul.f32 %v1863_v32, %v2533_v51  ;;  %3858 = vst [vmem:[#allocation7_spill] sm:$0xff] %v2872_v61 }
 0x73a   : > { %3859 = vst [vmem:[#allocation8_spill] sm:$0xff] %v2875_v62 }
 0x73b   : > { %v1143_v47 = vsub.f32 1.5, %v1142_v41  ;;  %3856 = vst [vmem:[#allocation5_spill] sm:$0xff] %v2862_v48 }
 0x73c   : > { %v2254_v20 = vpop.eup %2253  ;;  %3857 = vst [vmem:[#allocation6_spill] sm:$0xff] %v2865_v44 }
 0x73d   : > { %v1150_v21 = vmul.f32 %v2254_v20, %v1117_v7  ;;  %v1144_v22 = vmul.f32 %v2252_v6, %v1143_v47  ;;  %vm1156_vm4 = vweird.f32 %v2254_v20 }
 0x73e   : > { %vm1157_vm5 = vmor %vm1155_vm3, %vm1156_vm4 }
 0x73f   : > { %v1151_v23 = vmul.f32 %v2254_v20, %v1150_v21  ;;  %v1148_v26 = vsel %vm1147_vm2, %v2252_v6, %v1144_v22  ;;  %v2881_v6 = vpop.permute.xlu0 %1837 }
 0x740   : > { %1171 = vperm.xlu1 %2232, %v1148_v26   ;;  %3860 = vst [vmem:[#allocation9_spill] sm:$0xff] %v2881_v6 }
 0x741   : > { %v1152_v9 = vmul.f32 0.5, %v1151_v23 }
 0x743   : > { %v1153_v27 = vsub.f32 1.5, %v1152_v9 }
 0x745   : > { %v1154_v1 = vmul.f32 %v2254_v20, %v1153_v27 }
 0x747   : > { %v1158_v29 = vsel %vm1157_vm5, %v2254_v20, %v1154_v1 }
 0x748   : > { %1176 = vperm.xlu0 %2233, %v1158_v29  }
 0x7a2   : > { %v1162_v7 = vpop.permute.xlu0 %1161 }
 0x7a3   : > { %v1179_v11 = vmul.f32 %v1162_v7, %v2807_v16  ;;  %v1180_v24 = vmul.f32 %v1162_v7, %v2810_v19  ;;  %v1167_v16 = vpop.permute.xlu2 %1166 }
 0x7a4   : > { %v1182_v19 = vmul.f32 %v1167_v16, %v2775_v55 }
 0x7a5   : > { %v1207_v18 = vmul.f32 %v1190_v30, %v1179_v11  ;;  %v1208_v40 = vmul.f32 %v1190_v30, %v1180_v24  ;;  %v1181_v30 = vmul.f32 %v1167_v16, %v2773_v54 }
 0x7a7   : > { %v1235_v41 = vadd.f32 %v1218_v3, %v1207_v18  ;;  %v1236_v47 = vadd.f32 %v1218_v3, %v1208_v40  ;;  %v1210_v3 = vmul.f32 %v1195_v43, %v1182_v19  ;;  %v1209_v50 = vmul.f32 %v1195_v43, %v1181_v30 }
 0x7a9   : > { %v1243_v20 = vmul.f32 0.5, %v1235_v41  ;;  %v1244_v21 = vmul.f32 0.5, %v1236_v47  ;;  %v1238_v53 = vadd.f32 %v1223_v37, %v1210_v3  ;;  %v1237_v32 = vadd.f32 %v1223_v37, %v1209_v50 }
 0x7ab   : > { %2255 = vtanh.f32 %v1243_v20  ;;  %v1246_v42 = vmul.f32 0.5, %v1238_v53  ;;  %v1245_v54 = vmul.f32 0.5, %v1237_v32 }
 0x7ac   : > { %2257 = vtanh.f32 %v1244_v21 }
 0x7ad   : > { %2259 = vtanh.f32 %v1246_v42 }
 0x7ae   : > { %2261 = vtanh.f32 %v1245_v54 }
 0x7b1   : > { %v2256_v22 = vpop.eup %2255 }
 0x7b2   : > { %v2258_v23 = vpop.eup %2257  ;;  %v1259_v26 = vadd.f32 1.0, %v2256_v22  ;;  %v1172_v24 = vpop.permute.xlu1 %1171 }
 0x7b3   : > { %v1260_v9 = vadd.f32 1.0, %v2258_v23  ;;  %v2260_v55 = vpop.eup %2259  ;;  %v1183_v18 = vmul.f32 %v1172_v24, %v2784_v2 }
 0x7b4   : > { %v1267_v27 = vmul.f32 0.5, %v1259_v26  ;;  %v2262_v43 = vpop.eup %2261  ;;  %v1262_v37 = vadd.f32 1.0, %v2260_v55 }
 0x7b5   : > { %v1268_v1 = vmul.f32 0.5, %v1260_v9  ;;  %v1261_v60 = vadd.f32 1.0, %v2262_v43  ;;  %v1211_v40 = vmul.f32 %v2851_v34, %v1183_v18 }
 0x7b6   : > { %v2885_v29 = vmul.f32 %v1267_v27, %v1235_v41  ;;  %v1270_v49 = vmul.f32 0.5, %v1262_v37  ;;  %v1184_v41 = vmul.f32 %v1172_v24, %v2786_v58 }
 0x7b7   : > { %v2887_v33 = vmul.f32 %v1268_v1, %v1236_v47  ;;  %v1269_v39 = vmul.f32 0.5, %v1261_v60  ;;  %v1239_v47 = vadd.f32 %v2849_v31, %v1211_v40 }
 0x7b8   : > { %3861 = vst [vmem:[#allocation10_spill] sm:$0xff] %v2885_v29  ;;  %1283 = vrot.lane.b32.xlu1 %v2885_v29, %s2290_s19  ;;  %v2921_v7 = vmul.f32 %v1270_v49, %v1238_v53  ;;  %v1212_v2 = vmul.f32 %v2851_v34, %v1184_v41 }
 0x7b9   : > { %3862 = vst [vmem:[#allocation11_spill] sm:$0xff] %v2887_v33  ;;  %1387 = vrot.lane.b32.xlu0 %v2887_v33, %s2287_s16  ;;  %1291 = vrot.lane.b32.xlu2 %v2887_v33, %s2290_s19  ;;  %v2923_v11 = vmul.f32 %v1269_v39, %v1237_v32  ;;  %v1247_v20 = vmul.f32 0.5, %v1239_v47 }
 0x7ba   : > { %3865 = vst [vmem:[#allocation12_spill] sm:$0xff] %v2921_v7  ;;  %v1240_v21 = vadd.f32 %v2849_v31, %v1212_v2  ;;  %v1177_v16 = vpop.permute.xlu0 %1176 }
 0x7bb   : > { %3866 = vst [vmem:[#allocation13_spill] sm:$0xff] %v2923_v11  ;;  %2263 = vtanh.f32 %v1247_v20  ;;  %v1185_v30 = vmul.f32 %v1177_v16, %v2795_v15  ;;  %v1186_v3 = vmul.f32 %v1177_v16, %v2797_v17 }
 0x7bc   : > { %v1248_v58 = vmul.f32 0.5, %v1240_v21 }
 0x7bd   : > { %v1213_v50 = vmul.f32 %v2853_v0, %v1185_v30  ;;  %v1214_v53 = vmul.f32 %v2853_v0, %v1186_v3 }
 0x7be   : > { %2265 = vtanh.f32 %v1248_v58 }
 0x7bf   : > { %v1241_v42 = vadd.f32 %v2855_v4, %v1213_v50  ;;  %v1242_v15 = vadd.f32 %v2855_v4, %v1214_v53 }
 0x7c0   : > { %1379 = vrot.lane.b32.xlu1 %v2885_v29, %s2287_s16 }
 0x7c1   : > { %1355 = vrot.lane.b32.xlu2 %v2887_v33, %s2288_s17  ;;  %1347 = vrot.lane.b32.xlu0 %v2885_v29, %s2288_s17  ;;  %v2264_v34 = vpop.eup %2263  ;;  %v1249_v17 = vmul.f32 0.5, %v1241_v42  ;;  %v1250_v54 = vmul.f32 0.5, %v1242_v15 }
 0x7c2   : > { %v1263_v22 = vadd.f32 1.0, %v2264_v34 }
 0x7c3   : > { %2267 = vtanh.f32 %v1249_v17 }
 0x7c4   : > { %v2266_v31 = vpop.eup %2265  ;;  %v1271_v23 = vmul.f32 0.5, %v1263_v22  ;;  %2269 = vtanh.f32 %v1250_v54  ;;  %v3064_v54 = vld [vmem:[%s2378_s30 + $0x10] sm:$0xff] }
 0x7c5   : > { %v1264_v26 = vadd.f32 1.0, %v2266_v31  ;;  %3871 = vst [vmem:[#allocation18_spill] sm:$0xff] %v3064_v54 }
 0x7c6   : > { %v2961_v9 = vmul.f32 %v1271_v23, %v1239_v47 }
 0x7c7   : > { %v1272_v27 = vmul.f32 0.5, %v1264_v26 }
 0x7c8   : > { %1475 = vrot.lane.b32.xlu1 %v2885_v29, %s2285_s14  ;;  %3867 = vst [vmem:[#allocation14_spill] sm:$0xff] %v2961_v9 }
 0x7c9   : > { %1323 = vrot.lane.b32.xlu2 %v2887_v33, %s2289_s18  ;;  %1315 = vrot.lane.b32.xlu0 %v2885_v29, %s2289_s18  ;;  %v2969_v1 = vmul.f32 %v1272_v27, %v1240_v21  ;;  %v2268_v4 = vpop.eup %2267 }
 0x7ca   : > { %v2270_v39 = vpop.eup %2269  ;;  %v1265_v24 = vadd.f32 1.0, %v2268_v4 }
 0x7cb   : > { %3868 = vst [vmem:[#allocation15_spill] sm:$0xff] %v2969_v1  ;;  %v1266_v18 = vadd.f32 1.0, %v2270_v39 }
 0x7cc   : > { %v1273_v40 = vmul.f32 0.5, %v1265_v24 }
 0x7cd   : > { %v1274_v47 = vmul.f32 0.5, %v1266_v18 }
 0x7ce   : > { %v3023_v31 = vmul.f32 %v1273_v40, %v1241_v42 }
 0x7cf   : > { %v3025_v23 = vmul.f32 %v1274_v47, %v1242_v15 }
 0x7d0   : > { %1419 = vrot.lane.b32.xlu1 %v2887_v33, %s3863_s15  ;;  %3869 = vst [vmem:[#allocation16_spill] sm:$0xff] %v3023_v31 }
 0x7d1   : > { %1451 = vrot.lane.b32.xlu2 %v2887_v33, %s2284_s29  ;;  %1483 = vrot.lane.b32.xlu0 %v2887_v33, %s2285_s14  ;;  %3870 = vst [vmem:[#allocation17_spill] sm:$0xff] %v3025_v23 }
 0x7d8   : > { %1507 = vrot.lane.b32.xlu1 %v2885_v29, %s3864_s20 }
 0x7d9   : > { %1411 = vrot.lane.b32.xlu2 %v2885_v29, %s3863_s15  ;;  %1443 = vrot.lane.b32.xlu0 %v2885_v29, %s2284_s29 }
 0x7e0   : > { %1389 = vrot.lane.b32.xlu1 %v2921_v7, %s2287_s16 }
 0x7e1   : > { %1285 = vrot.lane.b32.xlu2 %v2923_v11, %s2290_s19  ;;  %1515 = vrot.lane.b32.xlu0 %v2887_v33, %s3864_s20 }
 0x7e8   : > { %1349 = vrot.lane.b32.xlu1 %v2923_v11, %s2288_s17 }
 0x7e9   : > { %1381 = vrot.lane.b32.xlu2 %v2923_v11, %s2287_s16  ;;  %1357 = vrot.lane.b32.xlu0 %v2921_v7, %s2288_s17 }
 0x7f0   : > { %1317 = vrot.lane.b32.xlu1 %v2923_v11, %s2289_s18 }
 0x7f1   : > { %1477 = vrot.lane.b32.xlu2 %v2923_v11, %s2285_s14  ;;  %1325 = vrot.lane.b32.xlu0 %v2921_v7, %s2289_s18 }
 0x7f8   : > { %1485 = vrot.lane.b32.xlu1 %v2921_v7, %s2285_s14 }
 0x7f9   : > { %1293 = vrot.lane.b32.xlu2 %v2921_v7, %s2290_s19  ;;  %1453 = vrot.lane.b32.xlu0 %v2921_v7, %s2284_s29 }
 0x800   : > { %1445 = vrot.lane.b32.xlu1 %v2923_v11, %s2284_s29 }
 0x801   : > { %1421 = vrot.lane.b32.xlu2 %v2921_v7, %s3863_s15  ;;  %1413 = vrot.lane.b32.xlu0 %v2923_v11, %s3863_s15 }
 0x808   : > { %1517 = vrot.lane.b32.xlu1 %v2921_v7, %s3864_s20 }
 0x809   : > { %1509 = vrot.lane.b32.xlu2 %v2923_v11, %s3864_s20  ;;  %1287 = vrot.lane.b32.xlu0 %v2961_v9, %s2290_s19 }
 0x810   : > { %1359 = vrot.lane.b32.xlu1 %v2969_v1, %s2288_s17 }
 0x811   : > { %1391 = vrot.lane.b32.xlu2 %v2969_v1, %s2287_s16  ;;  %1383 = vrot.lane.b32.xlu0 %v2961_v9, %s2287_s16 }
 0x813   : > { %v1292_v19 = vpop.permute.xlu2 %1291 }
 0x818   : > { %1319 = vrot.lane.b32.xlu1 %v2961_v9, %s2289_s18 }
 0x819   : > { %1351 = vrot.lane.b32.xlu2 %v2961_v9, %s2288_s17  ;;  %1327 = vrot.lane.b32.xlu0 %v2969_v1, %s2289_s18 }
 0x81b   : > { %v1356_v32 = vpop.permute.xlu2 %1355 }
 0x820   : > { %1487 = vrot.lane.b32.xlu1 %v2969_v1, %s2285_s14 }
 0x821   : > { %1479 = vrot.lane.b32.xlu2 %v2961_v9, %s2285_s14  ;;  %1455 = vrot.lane.b32.xlu0 %v2969_v1, %s2284_s29 }
 0x823   : > { %v1324_v55 = vpop.permute.xlu2 %1323 }
 0x828   : > { %1447 = vrot.lane.b32.xlu1 %v2961_v9, %s2284_s29 }
 0x829   : > { %1295 = vrot.lane.b32.xlu2 %v2969_v1, %s2290_s19  ;;  %1423 = vrot.lane.b32.xlu0 %v2969_v1, %s3863_s15 }
 0x82a   : > { %v1284_v0 = vpop.permute.xlu1 %1283 }
 0x82b   : > { %v1452_v43 = vpop.permute.xlu2 %1451  ;;  %v1299_v37 = vsel %vm647_vm13, %v1284_v0, %v1292_v19  ;;  %v1303_v60 = vsel %vm647_vm13, %v1292_v19, %v1284_v0  ;;  %v1388_v49 = vpop.permute.xlu0 %1387 }
 0x82c   : > { %v3089_v24 = vmul.f32 %v1303_v60, %v2667_v35  ;;  %v3092_v18 = vmul.f32 %v1299_v37, %v2669_v45 }
 0x830   : > { %1415 = vrot.lane.b32.xlu1 %v2961_v9, %s3863_s15 }
 0x831   : > { %1519 = vrot.lane.b32.xlu2 %v2969_v1, %s3864_s20  ;;  %1511 = vrot.lane.b32.xlu0 %v2961_v9, %s3864_s20 }
 0x832   : > { %v1380_v41 = vpop.permute.xlu1 %1379 }
 0x833   : > { %v1412_v2 = vpop.permute.xlu2 %1411  ;;  %v1395_v20 = vsel %vm718_vm10, %v1380_v41, %v1388_v49  ;;  %v1399_v21 = vsel %vm718_vm10, %v1388_v49, %v1380_v41  ;;  %v1348_v58 = vpop.permute.xlu0 %1347 }
 0x834   : > { %v3017_v34 = vsel %vm694_vm11, %v1348_v58, %v1356_v32  ;;  %v3021_v22 = vsel %vm694_vm11, %v1356_v32, %v1348_v58  ;;  %v3095_v41 = vmul.f32 %v1399_v21, %v2599_v56 }
 0x835   : > { %v3151_v57 = vmul.f32 %v3021_v22, %v2616_v63  ;;  %v3155_v5 = vmul.f32 %v3017_v34, %v2628_v38  ;;  %v3170_v22 = vld [vmem:[%s2378_s30 + $0x8] sm:$0xff] }
 0x836   : > { %3873 = vst [vmem:[#allocation20_spill] sm:$0xff] %v3170_v22 }
 0x838   : > { %1289 = vrot.lane.b32.xlu1 %v3023_v31, %s2290_s19 }
 0x839   : > { %1361 = vrot.lane.b32.xlu2 %v3025_v23, %s2288_s17  ;;  %1393 = vrot.lane.b32.xlu0 %v3025_v23, %s2287_s16 }
 0x83a   : > { %v1476_v26 = vpop.permute.xlu1 %1475 }
 0x83b   : > { %v1286_v27 = vpop.permute.xlu2 %1285  ;;  %v1316_v16 = vpop.permute.xlu0 %1315 }
 0x83c   : > { %v3035_v19 = vsel %vm670_vm12, %v1316_v16, %v1324_v55  ;;  %v3039_v30 = vsel %vm670_vm12, %v1324_v55, %v1316_v16 }
 0x840   : > { %1385 = vrot.lane.b32.xlu1 %v3023_v31, %s2287_s16 }
 0x841   : > { %1321 = vrot.lane.b32.xlu2 %v3023_v31, %s2289_s18  ;;  %1353 = vrot.lane.b32.xlu0 %v3023_v31, %s2288_s17 }
 0x842   : > { %v1420_v3 = vpop.permute.xlu1 %1419 }
 0x843   : > { %v1382_v50 = vpop.permute.xlu2 %1381  ;;  %v3049_v53 = vsel %vm742_vm9, %v1412_v2, %v1420_v3  ;;  %v3053_v32 = vsel %vm742_vm9, %v1420_v3, %v1412_v2  ;;  %v1484_v42 = vpop.permute.xlu0 %1483 }
 0x844   : > { %v3057_v15 = vsel %vm790_vm7, %v1476_v26, %v1484_v42  ;;  %v3061_v17 = vsel %vm790_vm7, %v1484_v42, %v1476_v26  ;;  %v3259_v11 = vmul.f32 %v3053_v32, %v2581_v28 }
 0x845   : > { %v1499_v44 = vmul.f32 %v3057_v15, %v2535_v52  ;;  %v3219_v62 = vmul.f32 %v3061_v17, %v2533_v51 }
 0x846   : > { %3878 = vst [vmem:[#allocation25_spill] sm:$0xff] %v3259_v11 }
 0x847   : > { %3875 = vst [vmem:[#allocation22_spill] sm:$0xff] %v3219_v62 }
 0x848   : > { %1839 = vrot.lane.b32.xlu1 %v3064_v54, %s2284_s29 }
 0x849   : > { %1489 = vrot.lane.b32.xlu2 %v3025_v23, %s2285_s14  ;;  %1481 = vrot.lane.b32.xlu0 %v3023_v31, %s2285_s14 }
 0x84a   : > { %v1508_v55 = vpop.permute.xlu1 %1507 }
 0x84b   : > { %v3072_v0 = vpop.permute.xlu2 %1477  ;;  %v1444_v4 = vpop.permute.xlu0 %1443 }
 0x84c   : > { %v3076_v49 = vsel %vm766_vm8, %v1444_v4, %v1452_v43  ;;  %v3080_v39 = vsel %vm766_vm8, %v1452_v43, %v1444_v4  ;;  %v3098_v43 = vmul.f32 %v1395_v20, %v2607_v59  ;;  %v3182_v4 = vmul.f32 %v3039_v30, %v2637_v13 }
 0x84d   : > { %v1467_v17 = vmul.f32 %v3076_v49, %v2556_v10 }
 0x850   : > { %1329 = vrot.lane.b32.xlu1 %v3025_v23, %s2289_s18 }
 0x851   : > { %1449 = vrot.lane.b32.xlu2 %v3023_v31, %s2284_s29  ;;  %1297 = vrot.lane.b32.xlu0 %v3025_v23, %s2290_s19 }
 0x852   : > { %v1390_v40 = vpop.permute.xlu1 %1389 }
 0x853   : > { %v1294_v47 = vpop.permute.xlu2 %1293  ;;  %v1396_v2 = vsel %vm718_vm10, %v1382_v50, %v1390_v40  ;;  %v1400_v58 = vsel %vm718_vm10, %v1390_v40, %v1382_v50  ;;  %v1516_v60 = vpop.permute.xlu0 %1515 }
 0x854   : > { %v1300_v37 = vsel %vm647_vm13, %v1286_v27, %v1294_v47  ;;  %v1304_v26 = vsel %vm647_vm13, %v1294_v47, %v1286_v27  ;;  %v3109_v21 = vmul.f32 %v1400_v58, %v2599_v56  ;;  %v3112_v20 = vmul.f32 %v1396_v2, %v2607_v59 }
 0x855   : > { %v3115_v16 = vmul.f32 %v1304_v26, %v2667_v35  ;;  %v3118_v3 = vmul.f32 %v1300_v37, %v2669_v45  ;;  %v3122_v50 = vsel %vm814_vm14, %v1508_v55, %v1516_v60  ;;  %v3126_v42 = vsel %vm814_vm14, %v1516_v60, %v1508_v55  ;;  %v3141_v55 = vld [vmem:[%s2378_s30 + $0x18] sm:$0xff] }
 0x856   : > { %3872 = vst [vmem:[#allocation19_spill] sm:$0xff] %v3141_v55  ;;  %v3186_v27 = vmul.f32 %v3035_v19, %v2656_v25 }
 0x858   : > { %1457 = vrot.lane.b32.xlu1 %v3025_v23, %s2284_s29 }
 0x859   : > { %1417 = vrot.lane.b32.xlu2 %v3023_v31, %s3863_s15  ;;  %1843 = vrot.lane.b32.xlu0 %v3141_v55, %s2284_s29 }
 0x85a   : > { %v1350_v2 = vpop.permute.xlu1 %1349 }
 0x85b   : > { %v1422_v58 = vpop.permute.xlu2 %1421  ;;  %v1358_v60 = vpop.permute.xlu0 %1357 }
 0x85c   : > { %v1364_v37 = vsel %vm694_vm11, %v1350_v2, %v1358_v60  ;;  %v1368_v26 = vsel %vm694_vm11, %v1358_v60, %v1350_v2 }
 0x85d   : > { %v3158_v47 = vmul.f32 %v1368_v26, %v2616_v63  ;;  %v3161_v40 = vmul.f32 %v1364_v37, %v2628_v38 }
 0x860   : > { %1425 = vrot.lane.b32.xlu1 %v3025_v23, %s3863_s15 }
 0x861   : > { %1841 = vrot.lane.b32.xlu2 %v3170_v22, %s2284_s29  ;;  %1825 = vrot.lane.b32.xlu0 %v3170_v22, %s3863_s15 }
 0x862   : > { %v1318_v34 = vpop.permute.xlu1 %1317 }
 0x863   : > { %v1510_v60 = vpop.permute.xlu2 %1509  ;;  %v1326_v37 = vpop.permute.xlu0 %1325 }
 0x864   : > { %v1332_v26 = vsel %vm670_vm12, %v1318_v34, %v1326_v37  ;;  %v1336_v2 = vsel %vm670_vm12, %v1326_v37, %v1318_v34  ;;  %v3199_v37 = vld [vmem:[%s2378_s30] sm:$0xff] }
 0x865   : > { %v3189_v48 = vmul.f32 %v1336_v2, %v2637_v13  ;;  %v3192_v61 = vmul.f32 %v1332_v26, %v2656_v25  ;;  %3874 = vst [vmem:[#allocation21_spill] sm:$0xff] %v3199_v37 }
 0x868   : > { %1821 = vrot.lane.b32.xlu1 %v3199_v37, %s3863_s15 }
 0x869   : > { %1823 = vrot.lane.b32.xlu2 %v3064_v54, %s3863_s15  ;;  %1807 = vrot.lane.b32.xlu0 %v3064_v54, %s2287_s16 }
 0x86a   : > { %v1486_v19 = vpop.permute.xlu1 %1485 }
 0x86b   : > { %v3207_v30 = vpop.permute.xlu2 %1391  ;;  %v1492_v2 = vsel %vm790_vm7, %v3072_v0, %v1486_v19  ;;  %v1496_v26 = vsel %vm790_vm7, %v1486_v19, %v3072_v0  ;;  %v1454_v34 = vpop.permute.xlu0 %1453 }
 0x86c   : > { %v1501_v7 = vmul.f32 %v1492_v2, %v2535_v52  ;;  %v3223_v33 = vmul.f32 %v1496_v26, %v2533_v51 }
 0x86e   : > { %v3225_v6 = vpack.c.bf16 %v1501_v7, %v1499_v44  ;;  %v3239_v44 = vmul.f32 %v3080_v39, %v2560_v12 }
 0x870   : > { %1827 = vrot.lane.b32.xlu1 %v3141_v55, %s3863_s15  ;;  %3876 = vst [vmem:[#allocation23_spill] sm:$0xff] %v3239_v44 }
 0x871   : > { %1805 = vrot.lane.b32.xlu2 %v3199_v37, %s2287_s16  ;;  %1521 = vrot.lane.b32.xlu0 %v3025_v23, %s3864_s20  ;;  %v1435_v23 = vmul.f32 %v3049_v53, %v2565_v14 }
 0x872   : > { %v1446_v15 = vpop.permute.xlu1 %1445 }
 0x873   : > { %v3241_v7 = vpop.permute.xlu2 %1351  ;;  %v1460_v0 = vsel %vm766_vm8, %v1446_v15, %v1454_v34  ;;  %v1464_v19 = vsel %vm766_vm8, %v1454_v34, %v1446_v15  ;;  %v1414_v2 = vpop.permute.xlu0 %1413 }
 0x874   : > { %v1469_v26 = vmul.f32 %v1460_v0, %v2556_v10  ;;  %v3249_v1 = vmul.f32 %v1464_v19, %v2560_v12  ;;  %v1428_v49 = vsel %vm742_vm9, %v1414_v2, %v1422_v58  ;;  %v1432_v39 = vsel %vm742_vm9, %v1422_v58, %v1414_v2 }
 0x875   : > { %v1437_v34 = vmul.f32 %v1428_v49, %v2565_v14  ;;  %v3263_v15 = vmul.f32 %v1432_v39, %v2581_v28  ;;  %v3293_v49 = vmul.f32 %v3126_v42, %v2699_v36 }
 0x876   : > { %3877 = vst [vmem:[#allocation24_spill] sm:$0xff] %v3249_v1  ;;  %v3265_v0 = vpack.c.bf16 %v1469_v26, %v1467_v17  ;;  %v3289_v26 = vmul.f32 %v3122_v50, %v2701_v8 }
 0x877   : > { %3879 = vst [vmem:[#allocation26_spill] sm:$0xff] %v3263_v15  ;;  %v3269_v29 = vpack.c.bf16 %v1437_v34, %v1435_v23  ;;  %v1584_v15 = vld [vmem:[%s3811_s10 + $0x8] sm:$0xff] }
 0x878   : > { %1513 = vrot.lane.b32.xlu1 %v3023_v31, %s3864_s20  ;;  %3881 = vst [vmem:[#allocation28_spill] sm:$0xff] %v3289_v26 }
 0x879   : > { %3880 = vst [vmem:[#allocation27_spill] sm:$0xff] %v3269_v29  ;;  %1811 = vrot.lane.b32.xlu2 %v3141_v55, %s2287_s16  ;;  %1789 = vrot.lane.b32.xlu0 %v3199_v37, %s2288_s17 }
 0x87a   : > { %v1518_v53 = vpop.permute.xlu1 %1517  ;;  %3882 = vst [vmem:[#allocation29_spill] sm:$0xff] %v3293_v49 }
 0x87b   : > { %v3279_v32 = vpop.permute.xlu2 %1479  ;;  %v1524_v17 = vsel %vm814_vm14, %v1510_v60, %v1518_v53  ;;  %v1528_v23 = vsel %vm814_vm14, %v1518_v53, %v1510_v60  ;;  %v3285_v2 = vpop.permute.xlu0 %1287 }
 0x87c   : > { %v3296_v39 = vmul.f32 %v1524_v17, %v2701_v8  ;;  %v3299_v34 = vmul.f32 %v1528_v23, %v2699_v36 }
 0x87e   : > { %3883 = vst [vmem:[#allocation30_spill] sm:$0xff] %v3296_v39 }
 0x87f   : > { %3884 = vst [vmem:[#allocation31_spill] sm:$0xff] %v3299_v34 }
 0x880   : > { %1809 = vrot.lane.b32.xlu1 %v3170_v22, %s2287_s16  ;;  %s2192_s16 = sshll.u32 %s3939_s26, 6 }
 0x881   : > { %1793 = vrot.lane.b32.xlu2 %v3170_v22, %s2288_s17  ;;  %1795 = vrot.lane.b32.xlu0 %v3141_v55, %s2288_s17 }
 0x882   : > { %v1360_v50 = vpop.permute.xlu1 %1359 }
 0x883   : > { %v3311_v42 = vpop.permute.xlu2 %1295  ;;  %v1384_v53 = vpop.permute.xlu0 %1383 }
 0x888   : > { %1791 = vrot.lane.b32.xlu1 %v3064_v54, %s2288_s17 }
 0x889   : > { %1775 = vrot.lane.b32.xlu2 %v3064_v54, %s2289_s18  ;;  %1777 = vrot.lane.b32.xlu0 %v3170_v22, %s2289_s18 }
 0x88a   : > { %v3319_v17 = vpop.permute.xlu1 %1319 }
 0x88b   : > { %v3321_v23 = vpop.permute.xlu0 %1327  ;;  %v1520_v60 = vpop.permute.xlu2 %1519 }
 0x890   : > { %1773 = vrot.lane.b32.xlu1 %v3199_v37, %s2289_s18 }
 0x891   : > { %1757 = vrot.lane.b32.xlu2 %v3199_v37, %s2290_s19  ;;  %1759 = vrot.lane.b32.xlu0 %v3064_v54, %s2290_s19 }
 0x892   : > { %v3329_v58 = vpop.permute.xlu1 %1487 }
 0x893   : > { %v3331_v19 = vpop.permute.xlu0 %1455  ;;  %v1362_v49 = vpop.permute.xlu2 %1361 }
 0x898   : > { %1779 = vrot.lane.b32.xlu1 %v3141_v55, %s2289_s18 }
 0x899   : > { %1763 = vrot.lane.b32.xlu2 %v3141_v55, %s2290_s19  ;;  %1869 = vrot.lane.b32.xlu0 %v3199_v37, %s3864_s20 }
 0x89a   : > { %v3339_v34 = vpop.permute.xlu1 %1447 }
 0x89b   : > { %v3341_v26 = vpop.permute.xlu0 %1423  ;;  %v3343_v39 = vpop.permute.xlu2 %1321 }
 0x8a0   : > { %1761 = vrot.lane.b32.xlu1 %v3170_v22, %s2290_s19  ;;  %s3784_s19 = scalar_lea.vmem %s3814_s13, %s2192_s16 }
 0x8a1   : > { %1873 = vrot.lane.b32.xlu2 %v3170_v22, %s3864_s20  ;;  %1875 = vrot.lane.b32.xlu0 %v3141_v55, %s3864_s20  ;;  %v1585_v22 = vld [vmem:[%s3811_s10 + $0x10] sm:$0xff] }
 0x8a2   : > { %v3351_v36 = vpop.permute.xlu1 %1415 }
 0x8a3   : > { %v1512_v8 = vpop.permute.xlu0 %1511  ;;  %v3369_v55 = vpop.permute.xlu2 %1489 }
 0x8a4   : > { %v3355_v37 = vsel %vm814_vm14, %v1512_v8, %v1520_v60  ;;  %v3359_v11 = vsel %vm814_vm14, %v1520_v60, %v1512_v8  ;;  %v1583_v8 = vld [vmem:[%s3811_s10] sm:$0xff]  ;;  %v1397_v60 = vsel %vm718_vm10, %v1384_v53, %v3207_v30 }
 0x8a5   : > { %3885 = vst [vmem:[#allocation32_spill] sm:$0xff] %v3355_v37 }
 0x8a6   : > { %3886 = vst [vmem:[#allocation33_spill] sm:$0xff] %v3359_v11 }
 0x8a8   : > { %1871 = vrot.lane.b32.xlu1 %v3064_v54, %s3864_s20  ;;  %v1401_v54 = vsel %vm718_vm10, %v3207_v30, %v1384_v53  ;;  %v1586_v30 = vld [vmem:[%s3811_s10 + $0x18] sm:$0xff] }
 0x8a9   : > { %1594 = vperm.xlu2 %2234, %v1584_v15   ;;  %1599 = vperm.xlu0 %2233, %v1585_v22   ;;  %v1407_v28 = vmul.f32 %v1401_v54, %v2599_v56  ;;  %v1369_v54 = vsel %vm694_vm11, %v1360_v50, %v3241_v7 }
 0x8aa   : > { %v3371_v37 = vpop.permute.xlu1 %1289 }
 0x8ab   : > { %v1394_v44 = vpop.permute.xlu0 %1393  ;;  %v3388_v31 = vpop.permute.xlu2 %1449 }
 0x8b0   : > { %1589 = vperm.xlu1 %2232, %v1583_v8   ;;  %v1408_v8 = vmul.f32 %v1397_v60, %v2607_v59  ;;  %v1493_v60 = vsel %vm790_vm7, %v3279_v32, %v3329_v58 }
 0x8b2   : > { %v1386_v15 = vpop.permute.xlu1 %1385 }
 0x8b3   : > { %v1398_v22 = vsel %vm718_vm10, %v1386_v15, %v1394_v44  ;;  %v1402_v11 = vsel %vm718_vm10, %v1394_v44, %v1386_v15  ;;  %v1354_v1 = vpop.permute.xlu0 %1353  ;;  %v1375_v15 = vmul.f32 %v1369_v54, %v2616_v63 }
 0x8b4   : > { %v1409_v9 = vmul.f32 %v1402_v11, %v2599_v56  ;;  %v1410_v29 = vmul.f32 %v1398_v22, %v2607_v59  ;;  %v1370_v44 = vsel %vm694_vm11, %v1362_v49, %v1354_v1  ;;  %v1366_v11 = vsel %vm694_vm11, %v1354_v1, %v1362_v49 }
 0x8b5   : > { %v1378_v22 = vmul.f32 %v1366_v11, %v2628_v38  ;;  %v3887_v49 = vpack.c.bf16 %v3109_v21, %v3095_v41  ;;  %v1333_v41 = vsel %vm670_vm12, %v3319_v17, %v3321_v23 }
 0x8b6   : > { %v1554_v53 = vpack.c.bf16 %v1410_v29, %v1408_v8  ;;  %v1553_v62 = vpack.c.bf16 %v1409_v9, %v1407_v28  ;;  %v1377_v28 = vmul.f32 %v1370_v44, %v2616_v63  ;;  %v1503_v8 = vmul.f32 %v1493_v60, %v2535_v52 }
 0x8b8   : > { %1604 = vperm.xlu1 %2232, %v1586_v30   ;;  %1643 = vmatpush.bf16.msrb.mxu2 %v1553_v62  ;;  %v1365_v62 = vsel %vm694_vm11, %v3241_v7, %v1360_v50  ;;  %v3888_v7 = vpack.c.bf16 %v3112_v20, %v3098_v43  ;;  %v1549_v44 = vpack.c.bf16 %v1377_v28, %v1375_v15 }
 0x8b9   : > { %1700 = vmatpush.bf16.msrb.mxu1 %v1554_v53  ;;  %v1376_v50 = vmul.f32 %v1365_v62, %v2628_v38  ;;  %v3426_v53 = vpop.permute.xlu2 %1417  ;;  %v1344_v62 = vmul.f32 %v1333_v41, %v2656_v25 }
 0x8ba   : > { %v3407_v29 = vpop.permute.xlu1 %1839 }
 0x8bb   : > { %v1482_v9 = vpop.permute.xlu0 %1481  ;;  %v1550_v11 = vpack.c.bf16 %v1378_v22, %v1376_v50 }
 0x8bc   : > { %v1494_v1 = vsel %vm790_vm7, %v1482_v9, %v3369_v55  ;;  %1644 = vmatpush.bf16.msrb.mxu2 %v3887_v49 }
 0x8bd   : > { %v1505_v30 = vmul.f32 %v1494_v1, %v2535_v52  ;;  %1701 = vmatpush.bf16.msrb.mxu1 %v3888_v7  ;;  %v1337_v52 = vsel %vm670_vm12, %v3321_v23, %v3319_v17  ;;  %v3889_v23 = vpack.c.bf16 %v3158_v47, %v3151_v57  ;;  %v1305_v57 = vsel %vm647_vm13, %v3311_v42, %v3285_v2 }
 0x8be   : > { %v1343_v28 = vmul.f32 %v1337_v52, %v2637_v13  ;;  %v1311_v7 = vmul.f32 %v1305_v57, %v2667_v35  ;;  %v1497_v52 = vsel %vm790_vm7, %v3329_v58, %v3279_v32 }
 0x8bf   : > { %v1569_v54 = vpack.c.bf16 %v1505_v30, %v1503_v8  ;;  %v1301_v30 = vsel %vm647_vm13, %v3285_v2, %v3311_v42  ;;  %v3891_v2 = vpack.c.bf16 %v3189_v48, %v3182_v4  ;;  %v2142_v48 = vld [vmem:[%s3810_s9] sm:$0xf]  ;;  %v2198_v4 = vld [vmem:[%s3810_s9 + $0x8] sm:$0xf0]  ;;  %v1504_v58 = vmul.f32 %v1497_v52, %v2533_v51 }
 0x8c0   : > { %1645 = vmatpush.bf16.msrb.mxu2 %v1549_v44  ;;  %v1312_v42 = vmul.f32 %v1301_v30, %v2669_v45  ;;  %v2154_v30 = vld [vmem:[%s3810_s9 + $0x18] sm:$0xf] }
 0x8c1   : > { %1662 = vmatpush.bf16.msra.mxu0 %v1569_v54  ;;  %2207 = vmatpush.bf16.msra.mxu3 %v1569_v54  ;;  %v3461_v47 = vpop.permute.xlu2 %1841 }
 0x8c2   : > { %1702 = vmatpush.bf16.msrb.mxu1 %v1550_v11  ;;  %v1330_v43 = vpop.permute.xlu1 %1329 }
 0x8c3   : > { %v1334_v21 = vsel %vm670_vm12, %v3343_v39, %v1330_v43  ;;  %v1338_v20 = vsel %vm670_vm12, %v1330_v43, %v3343_v39  ;;  %v1298_v60 = vpop.permute.xlu0 %1297  ;;  %v3890_v39 = vpack.c.bf16 %v3161_v40, %v3155_v5  ;;  %v1461_v5 = vsel %vm766_vm8, %v3339_v34, %v3331_v19 }
 0x8c4   : > { %v1345_v15 = vmul.f32 %v1338_v20, %v2637_v13  ;;  %v1346_v17 = vmul.f32 %v1334_v21, %v2656_v25  ;;  %1646 = vmatpush.bf16.msrb.mxu2 %v3889_v23  ;;  %v1306_v49 = vsel %vm647_vm13, %v1298_v60, %v3371_v37  ;;  %v1471_v54 = vmul.f32 %v1461_v5, %v2556_v10  ;;  %v3897_v5 = vld [vmem:[#allocation27_spill] sm:$0xff] }
 0x8c5   : > { %1663 = vmatpush.bf16.msra.mxu0 %v3225_v6  ;;  %2208 = vmatpush.bf16.msra.mxu3 %v3225_v6  ;;  %v1302_v6 = vsel %vm647_vm13, %v3371_v37, %v1298_v60  ;;  %v1313_v40 = vmul.f32 %v1306_v49, %v2667_v35  ;;  %v1498_v37 = vsel %vm790_vm7, %v3369_v55, %v1482_v9  ;;  %vm3935_vm7 = vmmov %vm3934_vm0 }
 0x8c6   : > { %1703 = vmatpush.bf16.msrb.mxu1 %v3890_v39  ;;  %v1545_v22 = vpack.c.bf16 %v1345_v15, %v1343_v28  ;;  %v1546_v1 = vpack.c.bf16 %v1346_v17, %v1344_v62  ;;  %v1314_v11 = vmul.f32 %v1302_v6, %v2669_v45  ;;  %v3892_v43 = vpack.c.bf16 %v3192_v61, %v3186_v27  ;;  %v3898_v6 = vld [vmem:[#allocation14_spill] sm:$0xff] }
 0x8c7   : > { %v1541_v55 = vpack.c.bf16 %v1313_v40, %v1311_v7  ;;  %v1506_v21 = vmul.f32 %v1498_v37, %v2533_v51  ;;  %v1429_v61 = vsel %vm742_vm9, %v3351_v36, %v3341_v26  ;;  %v2143_v15 = vor.u32 %v2198_v4, %v2142_v48  ;;  %v3899_v40 = vld [vmem:[#allocation16_spill] sm:$0xff]  ;;  %v3900_v7 = vld [vmem:[#allocation2_spill] sm:$0xff] }
 0x8c8   : > { %1647 = vmatpush.bf16.msrb.mxu2 %v1545_v22  ;;  %v1542_v20 = vpack.c.bf16 %v1314_v11, %v1312_v42  ;;  %v1439_v51 = vmul.f32 %v1429_v61, %v2565_v14  ;;  %v3893_v23 = vpack.c.bf16 %v3115_v16, %v3089_v24  ;;  %v3894_v22 = vpack.c.bf16 %v3118_v3, %v3092_v18  ;;  %v2144_v37 = vld [vmem:[%s3810_s9 + $0xc] sm:$0xf0] }
 0x8c9   : > { %v3510_v27 = vpop.permute.xlu2 %1823  ;;  %v1570_v60 = vpack.c.bf16 %v1506_v21, %v1504_v58  ;;  %v1465_v24 = vsel %vm766_vm8, %v3331_v19, %v3339_v34 }
 0x8ca   : > { %1704 = vmatpush.bf16.msrb.mxu1 %v1546_v1  ;;  %v1458_v8 = vpop.permute.xlu1 %1457 }
 0x8cb   : > { %v1462_v50 = vsel %vm766_vm8, %v3388_v31, %v1458_v8  ;;  %v3479_v44 = vpop.permute.xlu0 %1843  ;;  %v1466_v39 = vsel %vm766_vm8, %v1458_v8, %v3388_v31  ;;  %v1472_v31 = vmul.f32 %v1465_v24, %v2560_v12  ;;  %v1433_v8 = vsel %vm742_vm9, %v3341_v26, %v3351_v36  ;;  %v2200_v36 = vld [vmem:[%s3810_s9 + $0x1c] sm:$0xf]  ;;  %v2156_v26 = vld [vmem:[%s3810_s9 + $0x24] sm:$0xf0]  ;;  %v3911_v24 = vld [vmem:[#allocation4_spill] sm:$0xff] }
 0x8cc   : > { %v1473_v41 = vmul.f32 %v1462_v50, %v2556_v10  ;;  %1648 = vmatpush.bf16.msrb.mxu2 %v3891_v2  ;;  %v1474_v16 = vmul.f32 %v1466_v39, %v2560_v12  ;;  %v1440_v11 = vmul.f32 %v1433_v8, %v3900_v7  ;;  %v3902_v2 = vld [vmem:[#allocation23_spill] sm:$0xff]  ;;  %v3581_v58 = vor.u32 %v2200_v36, %v2156_v26  ;;  %v3915_v8 = vld [vmem:[#allocation9_spill] sm:$0xff] }
 0x8cd   : > { %v3909_v39 = vld [vmem:[#allocation15_spill] sm:$0xff] }
 0x8ce   : > { %1705 = vmatpush.bf16.msrb.mxu1 %v3892_v43  ;;  %v1565_v9 = vpack.c.bf16 %v1473_v41, %v1471_v54  ;;  %v1566_v19 = vpack.c.bf16 %v1474_v16, %v1472_v31  ;;  %v2197_v54 = vld [vmem:[%s3810_s9 + $0x4] sm:$0xf]  ;;  %v3901_v41 = vld [vmem:[#allocation24_spill] sm:$0xff] }
 0x8cf   : > { %v3903_v42 = vpack.c.bf16 %v3901_v41, %v3902_v2  ;;  %v3904_v43 = vld [vmem:[#allocation10_spill] sm:$0xff]  ;;  %v2147_v48 = vor.u32 %v2197_v54, %v2144_v37  ;;  %v3912_v16 = vld [vmem:[#allocation32_spill] sm:$0xff]  ;;  %v3916_v54 = vld [vmem:[#allocation11_spill] sm:$0xff] }
 0x8d0   : > { %1649 = vmatpush.bf16.msrb.mxu2 %v1541_v55  ;;  %1664 = vmatpush.bf16.msra.mxu0 %v1565_v9  ;;  %v3905_v55 = vld [vmem:[#allocation13_spill] sm:$0xff]  ;;  %v1535_v31 = vmul.f32 %v3912_v16, %v3911_v24  ;;  %v3917_v37 = vld [vmem:[#allocation12_spill] sm:$0xff] }
 0x8d1   : > { %2209 = vmatpush.bf16.msra.mxu3 %v1565_v9  ;;  %v3543_v57 = vpop.permute.xlu2 %1805  ;;  %v1555_v9 = vpack.c.bf16 %v3905_v55, %v3904_v43  ;;  %v1556_v36 = vpack.c.bf16 %v3917_v37, %v3916_v54  ;;  %v2199_v41 = vld [vmem:[%s3810_s9 + $0x10] sm:$0xf0]  ;;  %v3928_v16 = vld [vmem:[#allocation5_spill] sm:$0xff]  ;;  %v3933_v37 = vld [vmem:[#allocation18_spill] sm:$0xff] }
 0x8d2   : > { %1706 = vmatpush.bf16.msrb.mxu1 %v1542_v20  ;;  %v1426_v32 = vpop.permute.xlu1 %1425  ;;  %v3918_v55 = vld [vmem:[#allocation8_spill] sm:$0xff]  ;;  %v3932_v54 = vld [vmem:[#allocation21_spill] sm:$0xff] }
 0x8d3   : > { %v1430_v28 = vsel %vm742_vm9, %v3426_v53, %v1426_v32  ;;  %v3515_v62 = vpop.permute.xlu0 %1825  ;;  %v1434_v34 = vsel %vm742_vm9, %v1426_v32, %v3426_v53  ;;  %v2201_v53 = vld [vmem:[%s3810_s9 + $0x20] sm:$0xf0] }
 0x8d4   : > { %v1441_v17 = vmul.f32 %v1430_v28, %v2565_v14  ;;  %1650 = vmatpush.bf16.msrb.mxu2 %v3893_v23  ;;  %1665 = vmatpush.bf16.msra.mxu0 %v3265_v0  ;;  %v1442_v50 = vmul.f32 %v1434_v34, %v3900_v7  ;;  %v2155_v20 = vor.u32 %v2201_v53, %v2154_v30  ;;  %v3906_v32 = vld [vmem:[#allocation26_spill] sm:$0xff] }
 0x8d5   : > { %2210 = vmatpush.bf16.msra.mxu3 %v3265_v0  ;;  %v3895_v0 = vld [vmem:[#allocation22_spill] sm:$0xff]  ;;  %v1847_v30 = vsel %vm766_vm8, %v3461_v47, %v3915_v8 }
 0x8d6   : > { %1707 = vmatpush.bf16.msrb.mxu1 %v3894_v22  ;;  %v1561_v1 = vpack.c.bf16 %v1441_v17, %v1439_v51  ;;  %v3896_v49 = vpack.c.bf16 %v3223_v33, %v3895_v0  ;;  %v1557_v33 = vpack.c.bf16 %v3899_v40, %v3898_v6  ;;  %v1562_v4 = vpack.c.bf16 %v1442_v50, %v1440_v11  ;;  %v3910_v22 = vld [vmem:[#allocation17_spill] sm:$0xff]  ;;  %v3913_v0 = vld [vmem:[#allocation3_spill] sm:$0xff] }
 0x8d7   : > { %1651 = vmatmul.bf16.vlgmr.msrb.gmra.mxu2 %v2143_v15  ;;  %v1848_v6 = vsel %vm766_vm8, %v3479_v44, %v3407_v29  ;;  %v1846_v50 = vsel %vm766_vm8, %v3407_v29, %v3479_v44  ;;  %v2150_v11 = vld [vmem:[%s3810_s9 + $0x8] sm:$0xf]  ;;  %v1845_v29 = vsel %vm766_vm8, %v3915_v8, %v3461_v47  ;;  %vm3936_vm8 = vmmov %vm3934_vm0 }
 0x8d8   : > { %1719 = vmatpush.bf16.msra.mxu2 %v1570_v60  ;;  %1666 = vmatpush.bf16.msra.mxu0 %v1561_v1  ;;  %v3907_v60 = vld [vmem:[#allocation25_spill] sm:$0xff]  ;;  %v1852_v26 = vmul.f32 %v1848_v6, %v2560_v12  ;;  %v1851_v43 = vmul.f32 %v1846_v50, %v2556_v10 }
 0x8d9   : > { %1708 = vmatmul.bf16.vlgmr.msrb.gmra.mxu1 %v2143_v15  ;;  %2211 = vmatpush.bf16.msra.mxu3 %v1561_v1  ;;  %v3583_v61 = vpop.permute.xlu2 %1811  ;;  %v3908_v28 = vpack.c.bf16 %v3906_v32, %v3907_v60  ;;  %v1558_v1 = vpack.c.bf16 %v3910_v22, %v3909_v39  ;;  %v3921_v32 = vld [vmem:[#allocation30_spill] sm:$0xff]  ;;  %v3922_v60 = vld [vmem:[#allocation28_spill] sm:$0xff]  ;;  %v1849_v39 = vmul.f32 %v1845_v29, %v2556_v10 }
 0x8da   : > { %v3539_v18 = vpop.permute.xlu1 %1821 }
 0x8db   : > { %v3541_v3 = vpop.permute.xlu0 %1807  ;;  %v1831_v47 = vsel %vm742_vm9, %v3515_v62, %v3539_v18 }
 0x8dc   : > { %1720 = vmatpush.bf16.msra.mxu2 %v3896_v49  ;;  %1667 = vmatpush.bf16.msra.mxu0 %v3897_v5  ;;  %v3914_v49 = vld [vmem:[#allocation33_spill] sm:$0xff] }
 0x8dd   : > { %2212 = vmatpush.bf16.msra.mxu3 %v3897_v5  ;;  %v1536_v5 = vmul.f32 %v3914_v49, %v3913_v0 }
 0x8e0   : > { %1721 = vmatpush.bf16.msra.mxu2 %v1566_v19  ;;  %1668 = vmatpush.bf16.msra.mxu0 %v1557_v33 }
 0x8e1   : > { %2213 = vmatpush.bf16.msra.mxu3 %v1557_v33  ;;  %v1794_v53 = vpop.permute.xlu2 %1793 }
 0x8e2   : > { %v1828_v52 = vpop.permute.xlu1 %1827 }
 0x8e3   : > { %v1522_v21 = vpop.permute.xlu0 %1521  ;;  %v1832_v44 = vsel %vm742_vm9, %v1828_v52, %v3510_v27 }
 0x8e4   : > { %1722 = vmatpush.bf16.msra.mxu2 %v3903_v42  ;;  %1669 = vmatpush.bf16.msra.mxu0 %v1555_v9  ;;  %v1850_v42 = vmul.f32 %v1847_v30, %v2560_v12  ;;  %v3924_v12 = vld [vmem:[#allocation31_spill] sm:$0xff]  ;;  %v1836_v22 = vmul.f32 %v1832_v44, %v3900_v7 }
 0x8e5   : > { %2214 = vmatpush.bf16.msra.mxu3 %v1555_v9  ;;  %v3919_v9 = vld [vmem:[#allocation6_spill] sm:$0xff] }
 0x8e6   : > { %v1898_v49 = vpack.c.bf16 %v1852_v26, %v1850_v42  ;;  %v1816_v26 = vsel %vm718_vm10, %v3583_v61, %v3541_v3 }
 0x8e7   : > { %1656 = vmatmul.bf16.gmra.mxu2 %v2155_v20  ;;  %1670 = vmatmul.bf16.vlgmr.msra.gmra.mxu0 %v2147_v48 }
 0x8e8   : > { %1723 = vmatpush.bf16.msra.mxu2 %v1562_v4  ;;  %1675 = vmatmul.bf16.vlgmr.msra.gmra.mxu3 %v3581_v58  ;;  %v1830_v4 = vsel %vm742_vm9, %v3510_v27, %v1828_v52  ;;  %v1829_v27 = vsel %vm742_vm9, %v3539_v18, %v3515_v62  ;;  %v1834_v52 = vmul.f32 %v1831_v47, %v3900_v7  ;;  %vm3937_vm9 = vmmov %vm3934_vm0 }
 0x8e9   : > { %1713 = vmatmul.bf16.gmra.mxu1 %v2155_v20  ;;  %v1833_v10 = vmul.f32 %v1829_v27, %v2565_v14  ;;  %v1776_v6 = vpop.permute.xlu2 %1775 }
 0x8ea   : > { %v1514_v15 = vpop.permute.xlu1 %1513 }
 0x8eb   : > { %v1526_v51 = vsel %vm814_vm14, %v1514_v15, %v1522_v21  ;;  %v1530_v17 = vsel %vm814_vm14, %v1522_v21, %v1514_v15  ;;  %v3593_v23 = vpop.permute.xlu0 %1789  ;;  %v3920_v21 = vpack.c.bf16 %v3918_v55, %v3919_v9  ;;  %v3925_v15 = vld [vmem:[#allocation29_spill] sm:$0xff] }
 0x8ec   : > { %1724 = vmatpush.bf16.msra.mxu2 %v3908_v28  ;;  %v1537_v19 = vmul.f32 %v1526_v51, %v3911_v24  ;;  %v1538_v34 = vmul.f32 %v1530_v17, %v3913_v0  ;;  %v3923_v28 = vpack.c.bf16 %v3921_v32, %v3922_v60  ;;  %v3926_v51 = vpack.c.bf16 %v3924_v12, %v3925_v15 }
 0x8ed   : > { %v2151_v17 = vor.u32 %v2199_v41, %v2150_v11 }
 0x8ee   : > { %v1573_v40 = vpack.c.bf16 %v1537_v19, %v1535_v31  ;;  %v1574_v33 = vpack.c.bf16 %v1538_v34, %v1536_v5  ;;  %v1835_v5 = vmul.f32 %v1830_v4, %v2565_v14  ;;  %v1897_v19 = vpack.c.bf16 %v1851_v43, %v1849_v39 }
 0x8ef   : > { %v1896_v34 = vpack.c.bf16 %v1836_v22, %v1834_v52  ;;  %v1799_v43 = vsel %vm694_vm11, %v1794_v53, %v3593_v23 }
 0x8f0   : > { %1725 = vmatpush.bf16.msra.mxu2 %v1558_v1  ;;  %1687 = vmatpush.bf16.msrb.mxu3 %v1573_v40  ;;  %v3927_v1 = vld [vmem:[#allocation7_spill] sm:$0xff]  ;;  %v1895_v7 = vpack.c.bf16 %v1835_v5, %v1833_v10  ;;  %v3930_v40 = vld [vmem:[#allocation20_spill] sm:$0xff]  ;;  %v1801_v4 = vmul.f32 %v1799_v43, %v2616_v63 }
 0x8f1   : > { %1744 = vmatpush.bf16.msrb.mxu0 %v1574_v33  ;;  %v3929_v31 = vpack.c.bf16 %v3927_v1, %v3928_v16  ;;  %v3931_v33 = vld [vmem:[#allocation19_spill] sm:$0xff] }
 0x8f2   : > { %v1810_v2 = vpop.permute.xlu1 %1809  ;;  %v1894_v8 = vpack.c.bf16 %v3931_v33, %v3930_v40 }
 0x8f3   : > { %v1796_v20 = vpop.permute.xlu0 %1795  ;;  %v1813_v62 = vsel %vm718_vm10, %v3543_v57, %v1810_v2  ;;  %v1815_v14 = vsel %vm718_vm10, %v1810_v2, %v3543_v57  ;;  %v1797_v57 = vsel %vm694_vm11, %v3593_v23, %v1794_v53  ;;  %v1819_v2 = vmul.f32 %v1816_v26, %v2599_v56  ;;  %v2172_v26 = vld [vmem:[%s3812_s11 + $0x8] sm:$0xf0] }
 0x8f4   : > { %1726 = vmatpush.bf16.msra.mxu2 %v1556_v36  ;;  %1688 = vmatpush.bf16.msrb.mxu3 %v3923_v28  ;;  %v1818_v50 = vmul.f32 %v1813_v62, %v2607_v59  ;;  %v1893_v36 = vpack.c.bf16 %v3933_v37, %v3932_v54  ;;  %v1817_v29 = vmul.f32 %v1815_v14, %v2599_v56 }
 0x8f5   : > { %1745 = vmatpush.bf16.msrb.mxu0 %v3926_v51  ;;  %v1802_v9 = vmul.f32 %v1797_v57, %v2628_v38  ;;  %v2205_v57 = vld [vmem:[%s3812_s11 + $0x14] sm:$0xf] }
 0x8f7   : > { %1727 = vmatmul.bf16.vlgmr.msra.gmra.mxu2 %v2147_v48  ;;  %v1814_v48 = vsel %vm718_vm10, %v3541_v3, %v3583_v61  ;;  %v2202_v61 = vld [vmem:[%s3810_s9 + $0x28] sm:$0xf0] }
 0x8f8   : > { %1969 = vmatpush.bf16.msrb.mxu2 %v3920_v21  ;;  %1931 = vmatpush.bf16.msra.mxu3 %v3929_v31  ;;  %v1820_v41 = vmul.f32 %v1814_v48, %v2607_v59  ;;  %v2162_v59 = vld [vmem:[%s3810_s9 + $0x20] sm:$0xf]  ;;  %v1891_v21 = vpack.c.bf16 %v1819_v2, %v1817_v29 }
 0x8f9   : > { %2166 = vmatmul.msk.bf16.vlgmr.msrb.gmra.mxu0 %vm1000_vm15, %v2151_v17  ;;  %2164 = vmatmul.msk.bf16.vlgmr.msrb.gmra.mxu3 %vm1000_vm15, %v2151_v17  ;;  %v2163_v47 = vor.u32 %v2202_v61, %v2162_v59 }
 0x8fa   : > { %v1792_v18 = vpop.permute.xlu1 %1791  ;;  %v1892_v3 = vpack.c.bf16 %v1820_v41, %v1818_v50 }
 0x8fb   : > { %v1778_v30 = vpop.permute.xlu0 %1777  ;;  %v1798_v11 = vsel %vm694_vm11, %v1792_v18, %v1796_v20  ;;  %v1800_v44 = vsel %vm694_vm11, %v1796_v20, %v1792_v18  ;;  %v1758_v20 = vpop.permute.xlu2 %1757 }
 0x8fc   : > { %1970 = vmatpush.bf16.msrb.mxu2 %v1898_v49  ;;  %1932 = vmatpush.bf16.msra.mxu3 %v1897_v19  ;;  %v1804_v42 = vmul.f32 %v1798_v11, %v2628_v38  ;;  %v1803_v56 = vmul.f32 %v1800_v44, %v2616_v63  ;;  %v2180_v44 = vld [vmem:[%s3812_s11 + $0x18] sm:$0xf0] }
 0x8fd   : > { %v2183_v2 = vor.u32 %v2205_v57, %v2180_v44 }
 0x8fe   : > { %v1890_v32 = vpack.c.bf16 %v1804_v42, %v1802_v9  ;;  %v1889_v28 = vpack.c.bf16 %v1803_v56, %v1801_v4 }
 0x900   : > { %1971 = vmatpush.bf16.msrb.mxu2 %v1896_v34  ;;  %1933 = vmatpush.bf16.msra.mxu3 %v1895_v7  ;;  %v2170_v34 = vld [vmem:[%s3812_s11] sm:$0xf] }
 0x902   : > { %v1774_v55 = vpop.permute.xlu1 %1773 }
 0x903   : > { %v1760_v60 = vpop.permute.xlu0 %1759  ;;  %v1781_v38 = vsel %vm670_vm12, %v1774_v55, %v1778_v30  ;;  %v1783_v23 = vsel %vm670_vm12, %v1778_v30, %v1774_v55  ;;  %v1764_v39 = vpop.permute.xlu2 %1763 }
 0x904   : > { %1972 = vmatpush.bf16.msrb.mxu2 %v1894_v8  ;;  %1934 = vmatpush.bf16.msra.mxu3 %v1893_v36  ;;  %v1785_v15 = vmul.f32 %v1783_v23, %v2637_v13  ;;  %v1786_v51 = vmul.f32 %v1781_v38, %v2656_v25  ;;  %v1766_v31 = vsel %vm647_vm13, %v1760_v60, %v1764_v39  ;;  %v2203_v36 = vld [vmem:[%s3812_s11 + $0x4] sm:$0xf] }
 0x905   : > { %v1768_v49 = vsel %vm647_vm13, %v1764_v39, %v1760_v60  ;;  %v1772_v5 = vmul.f32 %v1766_v31, %v2669_v45  ;;  %v2175_v41 = vor.u32 %v2203_v36, %v2172_v26 }
 0x907   : > { %1732 = vmatmul.bf16.gmra.mxu2 %v3581_v58 }
 0x908   : > { %1973 = vmatpush.bf16.msrb.mxu2 %v1892_v3  ;;  %1935 = vmatpush.bf16.msra.mxu3 %v1891_v21 }
 0x909   : > { %2167 = vmatmul.msk.bf16.gmra.mxu0 %vm1000_vm15, %v2163_v47  ;;  %2165 = vmatmul.msk.bf16.gmra.mxu3 %vm1000_vm15, %v2163_v47 }
 0x90a   : > { %v1780_v53 = vpop.permute.xlu1 %1779 }
 0x90b   : > { %v1782_v63 = vsel %vm670_vm12, %v1776_v6, %v1780_v53  ;;  %v1784_v12 = vsel %vm670_vm12, %v1780_v53, %v1776_v6  ;;  %v1870_v16 = vpop.permute.xlu0 %1869  ;;  %v2204_v6 = vld [vmem:[%s3812_s11 + $0x4] sm:$0xf0]  ;;  %v1874_v40 = vpop.permute.xlu2 %1873 }
 0x90c   : > { %1974 = vmatpush.bf16.msrb.mxu2 %v1890_v32  ;;  %1936 = vmatpush.bf16.msra.mxu3 %v1889_v28  ;;  %v1787_v58 = vmul.f32 %v1784_v12, %v2637_v13  ;;  %v1788_v17 = vmul.f32 %v1782_v63, %v2656_v25  ;;  %v1771_v25 = vmul.f32 %v1768_v49, %v2667_v35 }
 0x90d   : > { %v2171_v7 = vor.u32 %v2204_v6, %v2170_v34  ;;  %v1877_v33 = vsel %vm814_vm14, %v1870_v16, %v1874_v40 }
 0x90e   : > { %v1887_v22 = vpack.c.bf16 %v1787_v58, %v1785_v15  ;;  %v1888_v1 = vpack.c.bf16 %v1788_v17, %v1786_v51  ;;  %v1881_v30 = vmul.f32 %v1877_v33, %v3911_v24 }
 0x910   : > { %1937 = vmatpush.bf16.msra.mxu3 %v1887_v22  ;;  %1975 = vmatpush.bf16.msrb.mxu2 %v1888_v1 }
 0x912   : > { %v1762_v27 = vpop.permute.xlu1 %1761 }
 0x913   : > { %v1765_v52 = vsel %vm647_vm13, %v1758_v20, %v1762_v27  ;;  %v1767_v13 = vsel %vm647_vm13, %v1762_v27, %v1758_v20  ;;  %v1595_v34 = vpop.permute.xlu2 %1594 }
 0x914   : > { %v1769_v19 = vmul.f32 %v1767_v13, %v2667_v35  ;;  %v1770_v10 = vmul.f32 %v1765_v52, %v2669_v45  ;;  %v1879_v35 = vsel %vm814_vm14, %v1874_v40, %v1870_v16  ;;  %v1876_v45 = vpop.permute.xlu0 %1875 }
 0x915   : > { %v1882_v50 = vmul.f32 %v1879_v35, %v3913_v0 }
 0x916   : > { %v1885_v62 = vpack.c.bf16 %v1771_v25, %v1769_v19  ;;  %v1886_v18 = vpack.c.bf16 %v1772_v5, %v1770_v10 }
 0x918   : > { %1938 = vmatpush.bf16.msra.mxu3 %v1885_v62  ;;  %1976 = vmatpush.bf16.msrb.mxu2 %v1886_v18 }
 0x91a   : > { %v1872_v8 = vpop.permute.xlu1 %1871 }
 0x91b   : > { %v1878_v48 = vsel %vm814_vm14, %v1872_v8, %v1876_v45  ;;  %v1880_v14 = vsel %vm814_vm14, %v1876_v45, %v1872_v8  ;;  %1939 = vmatmul.bf16.vlgmr.msra.gmra.mxu3 %v2171_v7  ;;  %1977 = vmatmul.bf16.vlgmr.msrb.gmra.mxu2 %v2171_v7 }
 0x91c   : > { %v1883_v54 = vmul.f32 %v1878_v48, %v3911_v24  ;;  %v1884_v37 = vmul.f32 %v1880_v14, %v3913_v0  ;;  %v2178_v24 = vld [vmem:[%s3812_s11 + $0x10] sm:$0xf]  ;;  %v2206_v0 = vld [vmem:[%s3812_s11 + $0x14] sm:$0xf0] }
 0x91d   : > { %v2179_v29 = vor.u32 %v2206_v0, %v2178_v24 }
 0x91e   : > { %v1901_v46 = vpack.c.bf16 %v1883_v54, %v1881_v30  ;;  %v1902_v11 = vpack.c.bf16 %v1884_v37, %v1882_v50  ;;  %v1600_v37 = vpop.permute.xlu0 %1599 }
 0x920   : > { %1957 = vmatpush.bf16.msra.mxu1 %v1901_v46  ;;  %1995 = vmatpush.bf16.msra.mxu0 %v1902_v11 }
 0x922   : > { %v1590_v39 = vpop.permute.xlu1 %1589 }
 0x923   : > { %2184 = vmatmul.msk.bf16.vlgmr.msra.gmra.mxu1 %vm3934_vm0, %v2175_v41  ;;  %2186 = vmatmul.msk.bf16.vlgmr.msra.gmra.mxu0 %vm3935_vm7, %v2175_v41 }
 0x92b   : > { %1944 = vmatmul.bf16.gmra.mxu3 %v2179_v29  ;;  %1982 = vmatmul.bf16.gmra.mxu2 %v2179_v29 }
 0x933   : > { %2185 = vmatmul.msk.bf16.gmra.mxu1 %vm3936_vm8, %v2183_v2  ;;  %2187 = vmatmul.msk.bf16.gmra.mxu0 %vm3937_vm9, %v2183_v2 }
 0x956   : > { %v1709_v21 = vpop.f32.mrf.mxu1 }
 0x957   : > { %v1710_v22 = vadd.f32 %v1709_v21, %v1590_v39 }
 0x95a   : > { %v1652_v42 = vpop.f32.mrf.mxu2 }
 0x95b   : > { %v1653_v1 = vadd.f32 %v1652_v42, %v1590_v39 }
 0x95e   : > { %v1711_v28 = vpop.f32.mrf.mxu1 }
 0x95f   : > { %v1712_v6 = vadd.f32 %v1711_v28, %v1595_v34 }
 0x962   : > { %v1654_v3 = vpop.f32.mrf.mxu2 }
 0x963   : > { %v1655_v7 = vadd.f32 %v1654_v3, %v1595_v34 }
 0x964   : > { %v1671_v59 = vpop.f32.mrf.mxu0 }
 0x965   : > { %v1672_v27 = vadd.f32 %v1671_v59, %v1653_v1 }
 0x966   : > { %v1714_v63 = vpop.f32.mrf.mxu1 }
 0x967   : > { %v1715_v36 = vadd.f32 %v1714_v63, %v1600_v37 }
 0x96a   : > { %v1657_v61 = vpop.f32.mrf.mxu2 }
 0x96b   : > { %v1676_v43 = vpop.f32.mrf.mxu3  ;;  %v1658_v26 = vadd.f32 %v1657_v61, %v1600_v37 }
 0x96c   : > { %v1673_v55 = vpop.f32.mrf.mxu0 }
 0x96d   : > { %v1674_v45 = vadd.f32 %v1673_v55, %v1655_v7  ;;  %v1677_v29 = vadd.f32 %v1676_v43, %v1658_v26  ;;  %v1605_v55 = vpop.permute.xlu1 %1604 }
 0x96e   : > { %v1716_v58 = vpop.f32.mrf.mxu1 }
 0x96f   : > { %v1717_v21 = vadd.f32 %v1716_v58, %v1605_v55 }
 0x972   : > { %v3772_v9 = vpop.f32.mrf.mxu2 }
 0x973   : > { %v3774_v56 = vpop.f32.mrf.mxu3  ;;  %v1660_v61 = vadd.f32 %v3772_v9, %v1605_v55 }
 0x976   : > { %v1747_v20 = vpop.f32.mrf.mxu0 }
 0x97a   : > { %v1728_v4 = vpop.f32.mrf.mxu2 }
 0x97b   : > { %v1729_v16 = vadd.f32 %v1728_v4, %v1710_v22 }
 0x97c   : > { %v1690_v47 = vpop.f32.mrf.mxu3 }
 0x97d   : > { %v1691_v25 = vadd.f32 %v1690_v47, %v1672_v27  ;;  %v1748_v5 = vadd.f32 %v1747_v20, %v1729_v16 }
 0x97e   : > { %v1749_v38 = vpop.f32.mrf.mxu0 }
 0x982   : > { %v1730_v60 = vpop.f32.mrf.mxu2 }
 0x983   : > { %v1731_v40 = vadd.f32 %v1730_v60, %v1712_v6 }
 0x984   : > { %v1692_v32 = vpop.f32.mrf.mxu3 }
 0x985   : > { %v1693_v14 = vadd.f32 %v1692_v32, %v1674_v45  ;;  %v1750_v30 = vadd.f32 %v1749_v38, %v1731_v40  ;;  %v1679_v32 = vadd.f32 %v3774_v56, %v1660_v61 }
 0x986   : > { %v1752_v12 = vpop.f32.mrf.mxu0 }
 0x98a   : > { %v1733_v53 = vpop.f32.mrf.mxu2 }
 0x98b   : > { %v1734_v41 = vadd.f32 %v1733_v53, %v1715_v36 }
 0x98c   : > { %v1695_v23 = vpop.f32.mrf.mxu3 }
 0x98d   : > { %v1696_v2 = vadd.f32 %v1695_v23, %v1677_v29  ;;  %v1753_v42 = vadd.f32 %v1752_v12, %v1734_v41 }
 0x98e   : > { %v3778_v17 = vpop.f32.mrf.mxu0 }
 0x992   : > { %v1735_v51 = vpop.f32.mrf.mxu2 }
 0x993   : > { %v1736_v4 = vadd.f32 %v1735_v51, %v1717_v21 }
 0x994   : > { %v3776_v15 = vpop.f32.mrf.mxu3 }
 0x995   : > { %v1698_v23 = vadd.f32 %v3776_v15, %v1679_v32  ;;  %v1755_v53 = vadd.f32 %v3778_v17, %v1736_v4 }
 0x99e   : > { %v1940_v31 = vpop.f32.mrf.mxu3  ;;  %v1978_v49 = vpop.f32.mrf.mxu2 }
 0x9a0   : > { %v1959_v52 = vpop.f32.mrf.mxu1  ;;  %v1997_v13 = vpop.f32.mrf.mxu0 }
 0x9a1   : > { %v1960_v19 = vadd.f32 %v1959_v52, %v1940_v31  ;;  %v1998_v10 = vadd.f32 %v1997_v13, %v1978_v49 }
 0x9a3   : > { %v2007_v62 = vadd.f32 %v1960_v19, %v1691_v25  ;;  %v2008_v18 = vadd.f32 %v1998_v10, %v1748_v5 }
 0x9a5   : > { %2015 = vst [vmem:[%s3784_s19] sm:$0xff] %v2007_v62 }
 0x9a6   : > { %2016 = vst [vmem:[%s3784_s19 + $0x8] sm:$0xff] %v2008_v18  ;;  %v1942_v33 = vpop.f32.mrf.mxu3  ;;  %v1980_v35 = vpop.f32.mrf.mxu2 }
 0x9a8   : > { %v1961_v8 = vpop.f32.mrf.mxu1  ;;  %v1999_v48 = vpop.f32.mrf.mxu0 }
 0x9a9   : > { %v1962_v50 = vadd.f32 %v1961_v8, %v1942_v33  ;;  %v2000_v54 = vadd.f32 %v1999_v48, %v1980_v35 }
 0x9ab   : > { %v2009_v46 = vadd.f32 %v1962_v50, %v1693_v14  ;;  %v2010_v11 = vadd.f32 %v2000_v54, %v1750_v30 }
 0x9ad   : > { %2017 = vst [vmem:[%s3784_s19 + $0x10] sm:$0xff] %v2009_v46 }
 0x9ae   : > { %2018 = vst [vmem:[%s3784_s19 + $0x18] sm:$0xff] %v2010_v11  ;;  %v1945_v24 = vpop.f32.mrf.mxu3  ;;  %v1983_v0 = vpop.f32.mrf.mxu2 }
 0x9b0   : > { %v1964_v57 = vpop.f32.mrf.mxu1  ;;  %v2002_v44 = vpop.f32.mrf.mxu0 }
 0x9b1   : > { %v1965_v3 = vadd.f32 %v1964_v57, %v1945_v24  ;;  %v2003_v59 = vadd.f32 %v2002_v44, %v1983_v0 }
 0x9b3   : > { %v2011_v20 = vadd.f32 %v1965_v3, %v1696_v2  ;;  %v2012_v47 = vadd.f32 %v2003_v59, %v1753_v42 }
 0x9b5   : > { %2019 = vst [vmem:[%s3784_s19 + $0x20] sm:$0xff] %v2011_v20 }
 0x9b6   : > { %2020 = vst [vmem:[%s3784_s19 + $0x28] sm:$0xff] %v2012_v47  ;;  %v1947_v43 = vpop.f32.mrf.mxu3  ;;  %v1985_v60 = vpop.f32.mrf.mxu2 }
 0x9b8   : > { %v1966_v28 = vpop.f32.mrf.mxu1  ;;  %v2004_v38 = vpop.f32.mrf.mxu0 }
 0x9b9   : > { %v1967_v63 = vadd.f32 %v1966_v28, %v1947_v43  ;;  %v2005_v12 = vadd.f32 %v2004_v38, %v1985_v60 }
 0x9bb   : > { %v2013_v9 = vadd.f32 %v1967_v63, %v1698_v23  ;;  %v2014_v58 = vadd.f32 %v2005_v12, %v1755_v53 }
 0x9bd   : > { %2021 = vst [vmem:[%s3784_s19 + $0x30] sm:$0xff] %v2013_v9 }
 0x9be   : > { %2022 = vst [vmem:[%s3784_s19 + $0x38] sm:$0xff] %v2014_v58 }
 0x9bf PF: > { %s23_s25 = sadd.s32 1, %s2281_s25  }
 0x9c0   : > { %p20_p4 = scmp.ge.s32.totalorder %s23_s25, 4  }
 0x9c2   :  { %22 = sbr.rel (!%p20_p4) target bundleno = 1 (0x1), region = 112 }

</bundles_post_ra>
